<compile_context>
chip_gen: v7x
topology: tpu7x:2x2x1
jax: 0.10.0
libtpu: 0.0.40
codegen_flags: <defaults>
</compile_context>

<pallas_src>
import math

import jax
import jax.numpy as jnp
from jax import lax
from jax.experimental import pallas as pl
from jax.experimental.pallas import tpu as pltpu

# ---------------- small synthetic config ----------------
BATCH = 2
SEQ = 8
HIDDEN = 32
HEADS = 4
HEAD_DIM = HIDDEN // HEADS
FFN = 64
LAYERS = 2
VOCAB = 100
MAX_POS = 64
SEGMENTS = 3
LABELS = 3
LN_EPS = 1e-6  # UER LayerNorm eps

# Rows of the packed per-layer "small parameter" tensor [L, SMALL_ROWS, SMALL_LANES].
ROW_BQ, ROW_BK, ROW_BV, ROW_BO = 0, 1, 2, 3
ROW_LN1G, ROW_LN1B = 4, 5
ROW_BFF1, ROW_BFF2 = 6, 7
ROW_LN2G, ROW_LN2B = 8, 9
SMALL_ROWS = 16     # padded to a sublane multiple
SMALL_LANES = 128   # one lane tile


# ---------------- in-kernel helpers ----------------
def _layernorm(x, g, b, eps=LN_EPS):
    # K-BERT/UER LayerNorm: gamma * (x - mean) / (std + eps) + beta, unbiased std (D-1).
    d = x.shape[-1]
    mean = jnp.mean(x, axis=-1, keepdims=True)
    var = jnp.sum((x - mean) ** 2, axis=-1, keepdims=True) * (1.0 / (d - 1))
    std = jnp.sqrt(var)
    return (x - mean) / (std + eps) * g + b


def _gelu(x):
    # UER gelu: x * 0.5 * (1 + erf(x / sqrt(2)))
    return x * 0.5 * (1.0 + lax.erf(x * (1.0 / math.sqrt(2.0))))


# ---------------- the fused kernel (one grid step = one transformer layer) ----------------
def _bert_fused_kernel(emb_ref, mask_ref, embg_ref, embb_ref,
                       wqkv_ref, wo_ref, wff1_ref, wff2_ref, small_ref,
                       w1_ref, b1_ref, w1a_ref, b1a_ref, w2_ref, b2_ref, oh_ref,
                       hid_ref, logits_ref, loss_ref):
    layer = pl.program_id(0)

    # Layer 0: embedding LayerNorm seeds the hidden state carried in hid_ref (output block,
    # constant index map -> VMEM resident across the whole grid).
    # TODO(synk): embedding/encoder/classifier dropout treated as identity (inference mode).
    @pl.when(layer == 0)
    def _():
        hid_ref[...] = _layernorm(emb_ref[...], embg_ref[...], embb_ref[...])

    h = hid_ref[...]                                   # [M, D]
    M, D = h.shape
    dh = HEAD_DIM
    scale = 1.0 / math.sqrt(dh)

    small = small_ref[0]                               # [SMALL_ROWS, SMALL_LANES]
    row = lambda r, w: small[r:r + 1, :w]              # [1, w] broadcastable bias / LN param

    # Q/K/V projections (weights stacked on a leading axis; no lane-offset slicing of a fused
    # QKV result).
    q = jnp.dot(h, wqkv_ref[0, 0], preferred_element_type=jnp.float32) + row(ROW_BQ, D)
    k = jnp.dot(h, wqkv_ref[0, 1], preferred_element_type=jnp.float32) + row(ROW_BK, D)
    v = jnp.dot(h, wqkv_ref[0, 2], preferred_element_type=jnp.float32) + row(ROW_BV, D)

    # Precomputed additive mask: block-diagonal batch structure + visible matrix, [M, M].
    add_mask = mask_ref[...]
    dn = (((1,), (1,)), ((), ()))                      # q @ k^T without an explicit transpose

    # Multi-head attention over all B*S rows at once; unrolled over heads only.
    ctx_parts = []
    for hh in range(HEADS):
        sl = slice(hh * dh, (hh + 1) * dh)
        s = lax.dot_general(q[:, sl], k[:, sl], dn, preferred_element_type=jnp.float32)
        s = s * scale + add_mask
        s = s - jnp.max(s, axis=-1, keepdims=True)
        p = jnp.exp(s)
        p = p / jnp.sum(p, axis=-1, keepdims=True)
        ctx_parts.append(jnp.dot(p, v[:, sl], preferred_element_type=jnp.float32))  # [M, dh]
    ctx = jnp.concatenate(ctx_parts, axis=-1)          # [M, D] head merge (lane concat)
    attn_out = jnp.dot(ctx, wo_ref[0], preferred_element_type=jnp.float32) + row(ROW_BO, D)

    inter = _layernorm(attn_out + h, row(ROW_LN1G, D), row(ROW_LN1B, D))

    ff = _gelu(jnp.dot(inter, wff1_ref[0], preferred_element_type=jnp.float32)
               + row(ROW_BFF1, FFN))
    ff = jnp.dot(ff, wff2_ref[0], preferred_element_type=jnp.float32) + row(ROW_BFF2, D)
    new_h = _layernorm(ff + inter, row(ROW_LN2G, D), row(ROW_LN2B, D))

    hid_ref[...] = new_h                               # carried to the next grid step

    # Last layer: fused classifier head + LogSoftmax + NLL loss (mean), logits never leave VMEM
    # until the final store.
    @pl.when(layer == pl.num_programs(0) - 1)
    def _():
        B = oh_ref.shape[0]
        S = M // B
        # pooling == "first": row b*S of each batch element.
        pooled = jnp.concatenate([new_h[b * S:b * S + 1, :] for b in range(B)], axis=0)  # [B, D]
        h1 = jnp.tanh(jnp.dot(pooled, w1_ref[...], preferred_element_type=jnp.float32)
                      + b1_ref[...])
        h1a = jnp.maximum(jnp.dot(h1, w1a_ref[...], preferred_element_type=jnp.float32)
                          + b1a_ref[...], 0.0)
        logits = jnp.dot(h1a, w2_ref[...], preferred_element_type=jnp.float32) + b2_ref[...]
        logits_ref[...] = logits.astype(logits_ref.dtype)

        z = logits - jnp.max(logits, axis=-1, keepdims=True)
        logsm = z - jnp.log(jnp.sum(jnp.exp(z), axis=-1, keepdims=True))
        nll = -jnp.sum(oh_ref[...] * logsm, axis=-1, keepdims=True)      # [B, 1]
        loss_ref[...] = jnp.sum(nll, axis=0, keepdims=True) * (1.0 / B)


# ---------------- parameter init (deterministic, synthetic) ----------------
def init_params(key):
    ks = iter(jax.random.split(key, 16))

    def nrm(shape, scale=0.02):
        return (scale * jax.random.normal(next(ks), shape)).astype(jnp.float32)

    D, L = HIDDEN, LAYERS
    # Packed per-layer small params: biases zero, LayerNorm gammas one (like the torch init).
    small = jnp.zeros((L, SMALL_ROWS, SMALL_LANES), jnp.float32)
    small = small.at[:, ROW_LN1G, :D].set(1.0)
    small = small.at[:, ROW_LN2G, :D].set(1.0)
    return {
        "word_emb": nrm((VOCAB, D)),
        "pos_emb": nrm((MAX_POS, D)),
        "seg_emb": nrm((SEGMENTS, D)),
        "emb_ln_g": jnp.ones((1, D), jnp.float32),
        "emb_ln_b": jnp.zeros((1, D), jnp.float32),
        # Encoder weights, stacked over layers and stored K-major ([in, out]).
        "wqkv": nrm((L, 3, D, D)),     # stacked Wq / Wk / Wv
        "wo": nrm((L, D, D)),
        "wff1": nrm((L, D, FFN)),
        "wff2": nrm((L, FFN, D)),
        "small": small,                # packed biases + LayerNorm gamma/beta
        # Classifier head (K-major).
        "w1": nrm((D, D)), "b1": jnp.zeros((1, D), jnp.float32),
        "w1a": nrm((D, D)), "b1a": jnp.zeros((1, D), jnp.float32),
        "w2": nrm((D, LABELS)), "b2": jnp.zeros((1, LABELS), jnp.float32),
    }


# ---------------- forward ----------------
def bert_classifier_forward(params, src, label, mask, pos, vm):
    B, S = src.shape
    D = HIDDEN
    M = B * S

    # Embedding gathers are JAX glue (no clean Pallas win at this size); the embedding
    # LayerNorm is fused into layer 0 of the kernel.
    word = jnp.take(params["word_emb"], src, axis=0)          # [B,S,D]
    posv = jnp.take(params["pos_emb"], pos, axis=0)           # [B,S,D]
    segv = jnp.take(params["seg_emb"], mask, axis=0)          # [B,S,D] (mask used as segment ids)
    emb_sum = (word + posv + segv).reshape(M, D)

    # Additive attention mask, built ONCE: block-diagonal over batch (cross-batch entries get
    # -10000 -> exp underflows to exactly 0) combined with the visible matrix (use_vm=True).
    vm_f = vm.astype(jnp.float32)                             # [B,S,S]
    eye_b = jnp.eye(B, dtype=jnp.float32)
    full_vm = (eye_b[:, None, :, None] * vm_f[:, :, None, :]).reshape(M, M)
    add_mask = (1.0 - full_vm) * (-10000.0)                   # [M, M]

    onehot = jax.nn.one_hot(label, LABELS, dtype=jnp.float32)

    inv = lambda shape: pl.BlockSpec(shape, lambda l: (0,) * len(shape))            # layer-invariant
    per_layer = lambda shape: pl.BlockSpec((1,) + shape, lambda l: (l,) + (0,) * len(shape))

    _, logits, loss = pl.pallas_call(
        _bert_fused_kernel,
        out_shape=(jax.ShapeDtypeStruct((M, D), jnp.float32),      # hidden-state carry (discarded)
                   jax.ShapeDtypeStruct((B, LABELS), jnp.float32),  # logits
                   jax.ShapeDtypeStruct((1, 1), jnp.float32)),      # loss
        grid=(LAYERS,),
        in_specs=[
            inv((M, D)),                          # emb_sum
            inv((M, M)),                          # additive attention mask
            inv((1, D)), inv((1, D)),             # embedding LN gamma / beta
            per_layer((3, D, D)),                 # Wq|Wk|Wv stacked
            per_layer((D, D)),                    # Wo
            per_layer((D, FFN)),                  # Wff1
            per_layer((FFN, D)),                  # Wff2
            per_layer((SMALL_ROWS, SMALL_LANES)),  # packed per-layer biases / LN params
            inv((D, D)), inv((1, D)),             # head W1, b1
            inv((D, D)), inv((1, D)),             # head W1a, b1a
            inv((D, LABELS)), inv((1, LABELS)),   # head W2, b2
            inv((B, LABELS)),                     # one-hot labels
        ],
        out_specs=(pl.BlockSpec((M, D), lambda l: (0, 0)),
                   pl.BlockSpec((B, LABELS), lambda l: (0, 0)),
                   pl.BlockSpec((1, 1), lambda l: (0, 0))),
        compiler_params=pltpu.CompilerParams(
            dimension_semantics=("arbitrary",),
            vmem_limit_bytes=32 * 1024 * 1024),
    )(emb_sum, add_mask, params["emb_ln_g"], params["emb_ln_b"],
      params["wqkv"], params["wo"], params["wff1"], params["wff2"], params["small"],
      params["w1"], params["b1"], params["w1a"], params["b1a"],
      params["w2"], params["b2"], onehot)

    return loss[0, 0], logits


if __name__ == "__main__":
    key = jax.random.PRNGKey(0)
    pkey, skey, lkey = jax.random.split(key, 3)
    params = init_params(pkey)

    src = jax.random.randint(skey, (BATCH, SEQ), 1, VOCAB, dtype=jnp.int32)
    label = jax.random.randint(lkey, (BATCH,), 0, LABELS, dtype=jnp.int32)
    mask = jnp.ones((BATCH, SEQ), dtype=jnp.int32)                          # segment / mask ids
    pos = jnp.tile(jnp.arange(SEQ, dtype=jnp.int32)[None, :], (BATCH, 1))   # soft-position index
    ii = jnp.arange(SEQ)
    vm = (jnp.abs(ii[:, None] - ii[None, :]) <= 3).astype(jnp.float32)      # visible matrix
    vm = jnp.tile(vm[None], (BATCH, 1, 1))                                  # [B,S,S]

    loss, logits = jax.jit(bert_classifier_forward)(params, src, label, mask, pos, vm)
    jax.block_until_ready((loss, logits))
    assert logits.shape == (BATCH, LABELS)
    assert loss.shape == ()
    print("KERNEL_OK")
</pallas_src>

<mosaic_0001>
module attributes {stable_mosaic.version = 11 : i64} {
  func.func @_bert_fused_kernel(%arg0: i32, %arg1: memref<16x32xf32, #tpu.memory_space<vmem>>, %arg2: memref<16x16xf32, #tpu.memory_space<vmem>>, %arg3: memref<1x32xf32, #tpu.memory_space<vmem>>, %arg4: memref<1x32xf32, #tpu.memory_space<vmem>>, %arg5: memref<1x3x32x32xf32, #tpu.memory_space<vmem>>, %arg6: memref<1x32x32xf32, #tpu.memory_space<vmem>>, %arg7: memref<1x32x64xf32, #tpu.memory_space<vmem>>, %arg8: memref<1x64x32xf32, #tpu.memory_space<vmem>>, %arg9: memref<1x16x128xf32, #tpu.memory_space<vmem>>, %arg10: memref<32x32xf32, #tpu.memory_space<vmem>>, %arg11: memref<1x32xf32, #tpu.memory_space<vmem>>, %arg12: memref<32x32xf32, #tpu.memory_space<vmem>>, %arg13: memref<1x32xf32, #tpu.memory_space<vmem>>, %arg14: memref<32x3xf32, #tpu.memory_space<vmem>>, %arg15: memref<1x3xf32, #tpu.memory_space<vmem>>, %arg16: memref<2x3xf32, #tpu.memory_space<vmem>>, %arg17: memref<16x32xf32, #tpu.memory_space<vmem>>, %arg18: memref<2x3xf32, #tpu.memory_space<vmem>>, %arg19: memref<1x1xf32, #tpu.memory_space<vmem>>) attributes {dimension_semantics = [#tpu.dimension_semantics<arbitrary>], iteration_bounds = array<i64: 2>, scalar_prefetch = 0 : i64, scratch_operands = 0 : i64, tpu.core_type = #tpu.core_type<tc>, window_params = [{pipeline_mode = #tpu.pipeline_mode<synchronous>, transform_indices = @transform_0, window_bounds = array<i64: 16, 32>}, {pipeline_mode = #tpu.pipeline_mode<synchronous>, transform_indices = @transform_1, window_bounds = array<i64: 16, 16>}, {pipeline_mode = #tpu.pipeline_mode<synchronous>, transform_indices = @transform_2, window_bounds = array<i64: 1, 32>}, {pipeline_mode = #tpu.pipeline_mode<synchronous>, transform_indices = @transform_3, window_bounds = array<i64: 1, 32>}, {transform_indices = @transform_4, window_bounds = array<i64: 1, 3, 32, 32>}, {transform_indices = @transform_5, window_bounds = array<i64: 1, 32, 32>}, {transform_indices = @transform_6, window_bounds = array<i64: 1, 32, 64>}, {transform_indices = @transform_7, window_bounds = array<i64: 1, 64, 32>}, {transform_indices = @transform_8, window_bounds = array<i64: 1, 16, 128>}, {pipeline_mode = #tpu.pipeline_mode<synchronous>, transform_indices = @transform_9, window_bounds = array<i64: 32, 32>}, {pipeline_mode = #tpu.pipeline_mode<synchronous>, transform_indices = @transform_10, window_bounds = array<i64: 1, 32>}, {pipeline_mode = #tpu.pipeline_mode<synchronous>, transform_indices = @transform_11, window_bounds = array<i64: 32, 32>}, {pipeline_mode = #tpu.pipeline_mode<synchronous>, transform_indices = @transform_12, window_bounds = array<i64: 1, 32>}, {pipeline_mode = #tpu.pipeline_mode<synchronous>, transform_indices = @transform_13, window_bounds = array<i64: 32, 3>}, {pipeline_mode = #tpu.pipeline_mode<synchronous>, transform_indices = @transform_14, window_bounds = array<i64: 1, 3>}, {pipeline_mode = #tpu.pipeline_mode<synchronous>, transform_indices = @transform_15, window_bounds = array<i64: 2, 3>}, {pipeline_mode = #tpu.pipeline_mode<synchronous>, transform_indices = @transform_16, window_bounds = array<i64: 16, 32>}, {pipeline_mode = #tpu.pipeline_mode<synchronous>, transform_indices = @transform_17, window_bounds = array<i64: 2, 3>}, {pipeline_mode = #tpu.pipeline_mode<synchronous>, transform_indices = @transform_18, window_bounds = array<i64: 1, 1>}]} {
    %c0_i32 = arith.constant 0 : i32
    %0 = arith.cmpi eq, %arg0, %c0_i32 : i32
    %1 = arith.extui %0 : i1 to i32
    %c0_i32_0 = arith.constant 0 : i32
    %2 = arith.cmpi ne, %1, %c0_i32_0 : i32
    scf.if %2 {
      %c0_67 = arith.constant 0 : index
      %c0_68 = arith.constant 0 : index
      %174 = vector.load %arg1[%c0_67, %c0_68] : memref<16x32xf32, #tpu.memory_space<vmem>>, vector<16x32xf32>
      %c0_69 = arith.constant 0 : index
      %c0_70 = arith.constant 0 : index
      %175 = vector.load %arg3[%c0_69, %c0_70] : memref<1x32xf32, #tpu.memory_space<vmem>>, vector<1x32xf32>
      %c0_71 = arith.constant 0 : index
      %c0_72 = arith.constant 0 : index
      %176 = vector.load %arg4[%c0_71, %c0_72] : memref<1x32xf32, #tpu.memory_space<vmem>>, vector<1x32xf32>
      %cst_73 = arith.constant dense<0.000000e+00> : vector<16xf32>
      %177 = vector.multi_reduction <add>, %174, %cst_73 [1] : vector<16x32xf32> to vector<16xf32>
      %178 = vector.shape_cast %177 : vector<16xf32> to vector<16x1xf32>
      %cst_74 = arith.constant 3.200000e+01 : f32
      %179 = vector.broadcast %cst_74 : f32 to vector<16x1xf32>
      %180 = arith.divf %178, %179 : vector<16x1xf32>
      %181 = vector.broadcast %180 : vector<16x1xf32> to vector<16x32xf32>
      %182 = arith.subf %174, %181 : vector<16x32xf32>
      %183 = arith.mulf %182, %182 : vector<16x32xf32>
      %cst_75 = arith.constant dense<0.000000e+00> : vector<16xf32>
      %184 = vector.multi_reduction <add>, %183, %cst_75 [1] : vector<16x32xf32> to vector<16xf32>
      %185 = vector.shape_cast %184 : vector<16xf32> to vector<16x1xf32>
      %cst_76 = arith.constant 0.0322580636 : f32
      %186 = vector.broadcast %cst_76 : f32 to vector<16x1xf32>
      %187 = arith.mulf %185, %186 : vector<16x1xf32>
      %188 = math.sqrt %187 : vector<16x1xf32>
      %189 = vector.broadcast %180 : vector<16x1xf32> to vector<16x32xf32>
      %190 = arith.subf %174, %189 : vector<16x32xf32>
      %cst_77 = arith.constant 9.99999997E-7 : f32
      %191 = vector.broadcast %cst_77 : f32 to vector<16x1xf32>
      %192 = arith.addf %188, %191 : vector<16x1xf32>
      %193 = vector.broadcast %192 : vector<16x1xf32> to vector<16x32xf32>
      %194 = arith.divf %190, %193 : vector<16x32xf32>
      %195 = vector.broadcast %175 : vector<1x32xf32> to vector<16x32xf32>
      %196 = arith.mulf %194, %195 : vector<16x32xf32>
      %197 = vector.broadcast %176 : vector<1x32xf32> to vector<16x32xf32>
      %198 = arith.addf %196, %197 : vector<16x32xf32>
      %c0_78 = arith.constant 0 : index
      %c0_79 = arith.constant 0 : index
      %199 = vector.load %arg17[%c0_78, %c0_79] : memref<16x32xf32, #tpu.memory_space<vmem>>, vector<16x32xf32>
      tpu.vector_store %arg17[%c0_78, %c0_79], %198 {strides = array<i32>} : memref<16x32xf32, #tpu.memory_space<vmem>>, vector<16x32xf32>,
    } else {
    }
    %c0 = arith.constant 0 : index
    %c0_1 = arith.constant 0 : index
    %3 = vector.load %arg17[%c0, %c0_1] : memref<16x32xf32, #tpu.memory_space<vmem>>, vector<16x32xf32>
    %c0_2 = arith.constant 0 : index
    %c0_3 = arith.constant 0 : index
    %c0_4 = arith.constant 0 : index
    %4 = vector.load %arg9[%c0_2, %c0_3, %c0_4] : memref<1x16x128xf32, #tpu.memory_space<vmem>>, vector<1x16x128xf32>
    %5 = vector.shape_cast %4 : vector<1x16x128xf32> to vector<16x128xf32>
    %c0_5 = arith.constant 0 : index
    %c0_6 = arith.constant 0 : index
    %c0_7 = arith.constant 0 : index
    %c0_8 = arith.constant 0 : index
    %6 = vector.load %arg5[%c0_5, %c0_6, %c0_7, %c0_8] : memref<1x3x32x32xf32, #tpu.memory_space<vmem>>, vector<1x1x32x32xf32>
    %7 = vector.shape_cast %6 : vector<1x1x32x32xf32> to vector<32x32xf32>
    %cst = arith.constant dense<0.000000e+00> : vector<16x32xf32>
    %8 = tpu.matmul %3, %7, %cst {dimension_numbers = #tpu.dot_dimension_numbers<[1], [0], [0], [1], [0, 0, 1, 1], [], []>} : vector<16x32xf32>, vector<32x32xf32>, vector<16x32xf32> -> vector<16x32xf32>
    %9 = vector.extract_strided_slice %5 {offsets = [0, 0], sizes = [1, 32], strides = [1, 1]} : vector<16x128xf32> to vector<1x32xf32>
    %10 = vector.broadcast %9 : vector<1x32xf32> to vector<16x32xf32>
    %11 = arith.addf %8, %10 : vector<16x32xf32>
    %c0_9 = arith.constant 0 : index
    %c1 = arith.constant 1 : index
    %c0_10 = arith.constant 0 : index
    %c0_11 = arith.constant 0 : index
    %12 = vector.load %arg5[%c0_9, %c1, %c0_10, %c0_11] : memref<1x3x32x32xf32, #tpu.memory_space<vmem>>, vector<1x1x32x32xf32>
    %13 = vector.shape_cast %12 : vector<1x1x32x32xf32> to vector<32x32xf32>
    %cst_12 = arith.constant dense<0.000000e+00> : vector<16x32xf32>
    %14 = tpu.matmul %3, %13, %cst_12 {dimension_numbers = #tpu.dot_dimension_numbers<[1], [0], [0], [1], [0, 0, 1, 1], [], []>} : vector<16x32xf32>, vector<32x32xf32>, vector<16x32xf32> -> vector<16x32xf32>
    %15 = vector.extract_strided_slice %5 {offsets = [1, 0], sizes = [1, 32], strides = [1, 1]} : vector<16x128xf32> to vector<1x32xf32>
    %16 = vector.broadcast %15 : vector<1x32xf32> to vector<16x32xf32>
    %17 = arith.addf %14, %16 : vector<16x32xf32>
    %c0_13 = arith.constant 0 : index
    %c2 = arith.constant 2 : index
    %c0_14 = arith.constant 0 : index
    %c0_15 = arith.constant 0 : index
    %18 = vector.load %arg5[%c0_13, %c2, %c0_14, %c0_15] : memref<1x3x32x32xf32, #tpu.memory_space<vmem>>, vector<1x1x32x32xf32>
    %19 = vector.shape_cast %18 : vector<1x1x32x32xf32> to vector<32x32xf32>
    %cst_16 = arith.constant dense<0.000000e+00> : vector<16x32xf32>
    %20 = tpu.matmul %3, %19, %cst_16 {dimension_numbers = #tpu.dot_dimension_numbers<[1], [0], [0], [1], [0, 0, 1, 1], [], []>} : vector<16x32xf32>, vector<32x32xf32>, vector<16x32xf32> -> vector<16x32xf32>
    %21 = vector.extract_strided_slice %5 {offsets = [2, 0], sizes = [1, 32], strides = [1, 1]} : vector<16x128xf32> to vector<1x32xf32>
    %22 = vector.broadcast %21 : vector<1x32xf32> to vector<16x32xf32>
    %23 = arith.addf %20, %22 : vector<16x32xf32>
    %c0_17 = arith.constant 0 : index
    %c0_18 = arith.constant 0 : index
    %24 = vector.load %arg2[%c0_17, %c0_18] : memref<16x16xf32, #tpu.memory_space<vmem>>, vector<16x16xf32>
    %25 = vector.extract_strided_slice %11 {offsets = [0, 0], sizes = [16, 8], strides = [1, 1]} : vector<16x32xf32> to vector<16x8xf32>
    %26 = vector.extract_strided_slice %17 {offsets = [0, 0], sizes = [16, 8], strides = [1, 1]} : vector<16x32xf32> to vector<16x8xf32>
    %cst_19 = arith.constant dense<0.000000e+00> : vector<16x16xf32>
    %27 = tpu.matmul %25, %26, %cst_19 {dimension_numbers = #tpu.dot_dimension_numbers<[1], [1], [0], [0], [0, 0, 1, 0], [], []>} : vector<16x8xf32>, vector<16x8xf32>, vector<16x16xf32> -> vector<16x16xf32>
    %cst_20 = arith.constant 0.353553385 : f32
    %28 = vector.broadcast %cst_20 : f32 to vector<16x16xf32>
    %29 = arith.mulf %27, %28 : vector<16x16xf32>
    %30 = arith.addf %29, %24 : vector<16x16xf32>
    %cst_21 = arith.constant dense<0xFF800000> : vector<16xf32>
    %31 = vector.multi_reduction <maximumf>, %30, %cst_21 [1] : vector<16x16xf32> to vector<16xf32>
    %32 = vector.shape_cast %31 : vector<16xf32> to vector<16x1xf32>
    %33 = vector.broadcast %32 : vector<16x1xf32> to vector<16x16xf32>
    %34 = arith.subf %30, %33 : vector<16x16xf32>
    %35 = math.exp %34 : vector<16x16xf32>
    %cst_22 = arith.constant dense<0.000000e+00> : vector<16xf32>
    %36 = vector.multi_reduction <add>, %35, %cst_22 [1] : vector<16x16xf32> to vector<16xf32>
    %37 = vector.shape_cast %36 : vector<16xf32> to vector<16x1xf32>
    %38 = vector.broadcast %37 : vector<16x1xf32> to vector<16x16xf32>
    %39 = arith.divf %35, %38 : vector<16x16xf32>
    %40 = vector.extract_strided_slice %23 {offsets = [0, 0], sizes = [16, 8], strides = [1, 1]} : vector<16x32xf32> to vector<16x8xf32>
    %cst_23 = arith.constant dense<0.000000e+00> : vector<16x8xf32>
    %41 = tpu.matmul %39, %40, %cst_23 {dimension_numbers = #tpu.dot_dimension_numbers<[1], [0], [0], [1], [0, 0, 1, 1], [], []>} : vector<16x16xf32>, vector<16x8xf32>, vector<16x8xf32> -> vector<16x8xf32>
    %42 = vector.extract_strided_slice %11 {offsets = [0, 8], sizes = [16, 8], strides = [1, 1]} : vector<16x32xf32> to vector<16x8xf32>
    %43 = vector.extract_strided_slice %17 {offsets = [0, 8], sizes = [16, 8], strides = [1, 1]} : vector<16x32xf32> to vector<16x8xf32>
    %cst_24 = arith.constant dense<0.000000e+00> : vector<16x16xf32>
    %44 = tpu.matmul %42, %43, %cst_24 {dimension_numbers = #tpu.dot_dimension_numbers<[1], [1], [0], [0], [0, 0, 1, 0], [], []>} : vector<16x8xf32>, vector<16x8xf32>, vector<16x16xf32> -> vector<16x16xf32>
    %cst_25 = arith.constant 0.353553385 : f32
    %45 = vector.broadcast %cst_25 : f32 to vector<16x16xf32>
    %46 = arith.mulf %44, %45 : vector<16x16xf32>
    %47 = arith.addf %46, %24 : vector<16x16xf32>
    %cst_26 = arith.constant dense<0xFF800000> : vector<16xf32>
    %48 = vector.multi_reduction <maximumf>, %47, %cst_26 [1] : vector<16x16xf32> to vector<16xf32>
    %49 = vector.shape_cast %48 : vector<16xf32> to vector<16x1xf32>
    %50 = vector.broadcast %49 : vector<16x1xf32> to vector<16x16xf32>
    %51 = arith.subf %47, %50 : vector<16x16xf32>
    %52 = math.exp %51 : vector<16x16xf32>
    %cst_27 = arith.constant dense<0.000000e+00> : vector<16xf32>
    %53 = vector.multi_reduction <add>, %52, %cst_27 [1] : vector<16x16xf32> to vector<16xf32>
    %54 = vector.shape_cast %53 : vector<16xf32> to vector<16x1xf32>
    %55 = vector.broadcast %54 : vector<16x1xf32> to vector<16x16xf32>
    %56 = arith.divf %52, %55 : vector<16x16xf32>
    %57 = vector.extract_strided_slice %23 {offsets = [0, 8], sizes = [16, 8], strides = [1, 1]} : vector<16x32xf32> to vector<16x8xf32>
    %cst_28 = arith.constant dense<0.000000e+00> : vector<16x8xf32>
    %58 = tpu.matmul %56, %57, %cst_28 {dimension_numbers = #tpu.dot_dimension_numbers<[1], [0], [0], [1], [0, 0, 1, 1], [], []>} : vector<16x16xf32>, vector<16x8xf32>, vector<16x8xf32> -> vector<16x8xf32>
    %59 = vector.extract_strided_slice %11 {offsets = [0, 16], sizes = [16, 8], strides = [1, 1]} : vector<16x32xf32> to vector<16x8xf32>
    %60 = vector.extract_strided_slice %17 {offsets = [0, 16], sizes = [16, 8], strides = [1, 1]} : vector<16x32xf32> to vector<16x8xf32>
    %cst_29 = arith.constant dense<0.000000e+00> : vector<16x16xf32>
    %61 = tpu.matmul %59, %60, %cst_29 {dimension_numbers = #tpu.dot_dimension_numbers<[1], [1], [0], [0], [0, 0, 1, 0], [], []>} : vector<16x8xf32>, vector<16x8xf32>, vector<16x16xf32> -> vector<16x16xf32>
    %cst_30 = arith.constant 0.353553385 : f32
    %62 = vector.broadcast %cst_30 : f32 to vector<16x16xf32>
    %63 = arith.mulf %61, %62 : vector<16x16xf32>
    %64 = arith.addf %63, %24 : vector<16x16xf32>
    %cst_31 = arith.constant dense<0xFF800000> : vector<16xf32>
    %65 = vector.multi_reduction <maximumf>, %64, %cst_31 [1] : vector<16x16xf32> to vector<16xf32>
    %66 = vector.shape_cast %65 : vector<16xf32> to vector<16x1xf32>
    %67 = vector.broadcast %66 : vector<16x1xf32> to vector<16x16xf32>
    %68 = arith.subf %64, %67 : vector<16x16xf32>
    %69 = math.exp %68 : vector<16x16xf32>
    %cst_32 = arith.constant dense<0.000000e+00> : vector<16xf32>
    %70 = vector.multi_reduction <add>, %69, %cst_32 [1] : vector<16x16xf32> to vector<16xf32>
    %71 = vector.shape_cast %70 : vector<16xf32> to vector<16x1xf32>
    %72 = vector.broadcast %71 : vector<16x1xf32> to vector<16x16xf32>
    %73 = arith.divf %69, %72 : vector<16x16xf32>
    %74 = vector.extract_strided_slice %23 {offsets = [0, 16], sizes = [16, 8], strides = [1, 1]} : vector<16x32xf32> to vector<16x8xf32>
    %cst_33 = arith.constant dense<0.000000e+00> : vector<16x8xf32>
    %75 = tpu.matmul %73, %74, %cst_33 {dimension_numbers = #tpu.dot_dimension_numbers<[1], [0], [0], [1], [0, 0, 1, 1], [], []>} : vector<16x16xf32>, vector<16x8xf32>, vector<16x8xf32> -> vector<16x8xf32>
    %76 = vector.extract_strided_slice %11 {offsets = [0, 24], sizes = [16, 8], strides = [1, 1]} : vector<16x32xf32> to vector<16x8xf32>
    %77 = vector.extract_strided_slice %17 {offsets = [0, 24], sizes = [16, 8], strides = [1, 1]} : vector<16x32xf32> to vector<16x8xf32>
    %cst_34 = arith.constant dense<0.000000e+00> : vector<16x16xf32>
    %78 = tpu.matmul %76, %77, %cst_34 {dimension_numbers = #tpu.dot_dimension_numbers<[1], [1], [0], [0], [0, 0, 1, 0], [], []>} : vector<16x8xf32>, vector<16x8xf32>, vector<16x16xf32> -> vector<16x16xf32>
    %cst_35 = arith.constant 0.353553385 : f32
    %79 = vector.broadcast %cst_35 : f32 to vector<16x16xf32>
    %80 = arith.mulf %78, %79 : vector<16x16xf32>
    %81 = arith.addf %80, %24 : vector<16x16xf32>
    %cst_36 = arith.constant dense<0xFF800000> : vector<16xf32>
    %82 = vector.multi_reduction <maximumf>, %81, %cst_36 [1] : vector<16x16xf32> to vector<16xf32>
    %83 = vector.shape_cast %82 : vector<16xf32> to vector<16x1xf32>
    %84 = vector.broadcast %83 : vector<16x1xf32> to vector<16x16xf32>
    %85 = arith.subf %81, %84 : vector<16x16xf32>
    %86 = math.exp %85 : vector<16x16xf32>
    %cst_37 = arith.constant dense<0.000000e+00> : vector<16xf32>
    %87 = vector.multi_reduction <add>, %86, %cst_37 [1] : vector<16x16xf32> to vector<16xf32>
    %88 = vector.shape_cast %87 : vector<16xf32> to vector<16x1xf32>
    %89 = vector.broadcast %88 : vector<16x1xf32> to vector<16x16xf32>
    %90 = arith.divf %86, %89 : vector<16x16xf32>
    %91 = vector.extract_strided_slice %23 {offsets = [0, 24], sizes = [16, 8], strides = [1, 1]} : vector<16x32xf32> to vector<16x8xf32>
    %cst_38 = arith.constant dense<0.000000e+00> : vector<16x8xf32>
    %92 = tpu.matmul %90, %91, %cst_38 {dimension_numbers = #tpu.dot_dimension_numbers<[1], [0], [0], [1], [0, 0, 1, 1], [], []>} : vector<16x16xf32>, vector<16x8xf32>, vector<16x8xf32> -> vector<16x8xf32>
    %93 = tpu.concatenate %41, %58, %75, %92 in 1 : vector<16x8xf32>, vector<16x8xf32>, vector<16x8xf32>, vector<16x8xf32> -> vector<16x32xf32>
    %c0_39 = arith.constant 0 : index
    %c0_40 = arith.constant 0 : index
    %c0_41 = arith.constant 0 : index
    %94 = vector.load %arg6[%c0_39, %c0_40, %c0_41] : memref<1x32x32xf32, #tpu.memory_space<vmem>>, vector<1x32x32xf32>
    %95 = vector.shape_cast %94 : vector<1x32x32xf32> to vector<32x32xf32>
    %cst_42 = arith.constant dense<0.000000e+00> : vector<16x32xf32>
    %96 = tpu.matmul %93, %95, %cst_42 {dimension_numbers = #tpu.dot_dimension_numbers<[1], [0], [0], [1], [0, 0, 1, 1], [], []>} : vector<16x32xf32>, vector<32x32xf32>, vector<16x32xf32> -> vector<16x32xf32>
    %97 = vector.extract_strided_slice %5 {offsets = [3, 0], sizes = [1, 32], strides = [1, 1]} : vector<16x128xf32> to vector<1x32xf32>
    %98 = vector.broadcast %97 : vector<1x32xf32> to vector<16x32xf32>
    %99 = arith.addf %96, %98 : vector<16x32xf32>
    %100 = arith.addf %99, %3 : vector<16x32xf32>
    %101 = vector.extract_strided_slice %5 {offsets = [4, 0], sizes = [1, 32], strides = [1, 1]} : vector<16x128xf32> to vector<1x32xf32>
    %102 = vector.extract_strided_slice %5 {offsets = [5, 0], sizes = [1, 32], strides = [1, 1]} : vector<16x128xf32> to vector<1x32xf32>
    %cst_43 = arith.constant dense<0.000000e+00> : vector<16xf32>
    %103 = vector.multi_reduction <add>, %100, %cst_43 [1] : vector<16x32xf32> to vector<16xf32>
    %104 = vector.shape_cast %103 : vector<16xf32> to vector<16x1xf32>
    %cst_44 = arith.constant 3.200000e+01 : f32
    %105 = vector.broadcast %cst_44 : f32 to vector<16x1xf32>
    %106 = arith.divf %104, %105 : vector<16x1xf32>
    %107 = vector.broadcast %106 : vector<16x1xf32> to vector<16x32xf32>
    %108 = arith.subf %100, %107 : vector<16x32xf32>
    %109 = arith.mulf %108, %108 : vector<16x32xf32>
    %cst_45 = arith.constant dense<0.000000e+00> : vector<16xf32>
    %110 = vector.multi_reduction <add>, %109, %cst_45 [1] : vector<16x32xf32> to vector<16xf32>
    %111 = vector.shape_cast %110 : vector<16xf32> to vector<16x1xf32>
    %cst_46 = arith.constant 0.0322580636 : f32
    %112 = vector.broadcast %cst_46 : f32 to vector<16x1xf32>
    %113 = arith.mulf %111, %112 : vector<16x1xf32>
    %114 = math.sqrt %113 : vector<16x1xf32>
    %115 = vector.broadcast %106 : vector<16x1xf32> to vector<16x32xf32>
    %116 = arith.subf %100, %115 : vector<16x32xf32>
    %cst_47 = arith.constant 9.99999997E-7 : f32
    %117 = vector.broadcast %cst_47 : f32 to vector<16x1xf32>
    %118 = arith.addf %114, %117 : vector<16x1xf32>
    %119 = vector.broadcast %118 : vector<16x1xf32> to vector<16x32xf32>
    %120 = arith.divf %116, %119 : vector<16x32xf32>
    %121 = vector.broadcast %101 : vector<1x32xf32> to vector<16x32xf32>
    %122 = arith.mulf %120, %121 : vector<16x32xf32>
    %123 = vector.broadcast %102 : vector<1x32xf32> to vector<16x32xf32>
    %124 = arith.addf %122, %123 : vector<16x32xf32>
    %c0_48 = arith.constant 0 : index
    %c0_49 = arith.constant 0 : index
    %c0_50 = arith.constant 0 : index
    %125 = vector.load %arg7[%c0_48, %c0_49, %c0_50] : memref<1x32x64xf32, #tpu.memory_space<vmem>>, vector<1x32x64xf32>
    %126 = vector.shape_cast %125 : vector<1x32x64xf32> to vector<32x64xf32>
    %cst_51 = arith.constant dense<0.000000e+00> : vector<16x64xf32>
    %127 = tpu.matmul %124, %126, %cst_51 {dimension_numbers = #tpu.dot_dimension_numbers<[1], [0], [0], [1], [0, 0, 1, 1], [], []>} : vector<16x32xf32>, vector<32x64xf32>, vector<16x64xf32> -> vector<16x64xf32>
    %128 = vector.extract_strided_slice %5 {offsets = [6, 0], sizes = [1, 64], strides = [1, 1]} : vector<16x128xf32> to vector<1x64xf32>
    %129 = vector.broadcast %128 : vector<1x64xf32> to vector<16x64xf32>
    %130 = arith.addf %127, %129 : vector<16x64xf32>
    %cst_52 = arith.constant 5.000000e-01 : f32
    %131 = vector.broadcast %cst_52 : f32 to vector<16x64xf32>
    %132 = arith.mulf %130, %131 : vector<16x64xf32>
    %cst_53 = arith.constant 0.707106769 : f32
    %133 = vector.broadcast %cst_53 : f32 to vector<16x64xf32>
    %134 = arith.mulf %130, %133 : vector<16x64xf32>
    %135 = math.erf %134 : vector<16x64xf32>
    %cst_54 = arith.constant 1.000000e+00 : f32
    %136 = vector.broadcast %cst_54 : f32 to vector<16x64xf32>
    %137 = arith.addf %136, %135 : vector<16x64xf32>
    %138 = arith.mulf %132, %137 : vector<16x64xf32>
    %c0_55 = arith.constant 0 : index
    %c0_56 = arith.constant 0 : index
    %c0_57 = arith.constant 0 : index
    %139 = vector.load %arg8[%c0_55, %c0_56, %c0_57] : memref<1x64x32xf32, #tpu.memory_space<vmem>>, vector<1x64x32xf32>
    %140 = vector.shape_cast %139 : vector<1x64x32xf32> to vector<64x32xf32>
    %cst_58 = arith.constant dense<0.000000e+00> : vector<16x32xf32>
    %141 = tpu.matmul %138, %140, %cst_58 {dimension_numbers = #tpu.dot_dimension_numbers<[1], [0], [0], [1], [0, 0, 1, 1], [], []>} : vector<16x64xf32>, vector<64x32xf32>, vector<16x32xf32> -> vector<16x32xf32>
    %142 = vector.extract_strided_slice %5 {offsets = [7, 0], sizes = [1, 32], strides = [1, 1]} : vector<16x128xf32> to vector<1x32xf32>
    %143 = vector.broadcast %142 : vector<1x32xf32> to vector<16x32xf32>
    %144 = arith.addf %141, %143 : vector<16x32xf32>
    %145 = arith.addf %144, %124 : vector<16x32xf32>
    %146 = vector.extract_strided_slice %5 {offsets = [8, 0], sizes = [1, 32], strides = [1, 1]} : vector<16x128xf32> to vector<1x32xf32>
    %147 = vector.extract_strided_slice %5 {offsets = [9, 0], sizes = [1, 32], strides = [1, 1]} : vector<16x128xf32> to vector<1x32xf32>
    %cst_59 = arith.constant dense<0.000000e+00> : vector<16xf32>
    %148 = vector.multi_reduction <add>, %145, %cst_59 [1] : vector<16x32xf32> to vector<16xf32>
    %149 = vector.shape_cast %148 : vector<16xf32> to vector<16x1xf32>
    %cst_60 = arith.constant 3.200000e+01 : f32
    %150 = vector.broadcast %cst_60 : f32 to vector<16x1xf32>
    %151 = arith.divf %149, %150 : vector<16x1xf32>
    %152 = vector.broadcast %151 : vector<16x1xf32> to vector<16x32xf32>
    %153 = arith.subf %145, %152 : vector<16x32xf32>
    %154 = arith.mulf %153, %153 : vector<16x32xf32>
    %cst_61 = arith.constant dense<0.000000e+00> : vector<16xf32>
    %155 = vector.multi_reduction <add>, %154, %cst_61 [1] : vector<16x32xf32> to vector<16xf32>
    %156 = vector.shape_cast %155 : vector<16xf32> to vector<16x1xf32>
    %cst_62 = arith.constant 0.0322580636 : f32
    %157 = vector.broadcast %cst_62 : f32 to vector<16x1xf32>
    %158 = arith.mulf %156, %157 : vector<16x1xf32>
    %159 = math.sqrt %158 : vector<16x1xf32>
    %160 = vector.broadcast %151 : vector<16x1xf32> to vector<16x32xf32>
    %161 = arith.subf %145, %160 : vector<16x32xf32>
    %cst_63 = arith.constant 9.99999997E-7 : f32
    %162 = vector.broadcast %cst_63 : f32 to vector<16x1xf32>
    %163 = arith.addf %159, %162 : vector<16x1xf32>
    %164 = vector.broadcast %163 : vector<16x1xf32> to vector<16x32xf32>
    %165 = arith.divf %161, %164 : vector<16x32xf32>
    %166 = vector.broadcast %146 : vector<1x32xf32> to vector<16x32xf32>
    %167 = arith.mulf %165, %166 : vector<16x32xf32>
    %168 = vector.broadcast %147 : vector<1x32xf32> to vector<16x32xf32>
    %169 = arith.addf %167, %168 : vector<16x32xf32>
    %c0_64 = arith.constant 0 : index
    %c0_65 = arith.constant 0 : index
    %170 = vector.load %arg17[%c0_64, %c0_65] : memref<16x32xf32, #tpu.memory_space<vmem>>, vector<16x32xf32>
    tpu.vector_store %arg17[%c0_64, %c0_65], %169 {strides = array<i32>} : memref<16x32xf32, #tpu.memory_space<vmem>>, vector<16x32xf32>,
    %c1_i32 = arith.constant 1 : i32
    %171 = arith.cmpi eq, %arg0, %c1_i32 : i32
    %172 = arith.extui %171 : i1 to i32
    %c0_i32_66 = arith.constant 0 : i32
    %173 = arith.cmpi ne, %172, %c0_i32_66 : i32
    scf.if %173 {
      %174 = vector.extract_strided_slice %169 {offsets = [0, 0], sizes = [1, 32], strides = [1, 1]} : vector<16x32xf32> to vector<1x32xf32>
      %175 = vector.extract_strided_slice %169 {offsets = [8, 0], sizes = [1, 32], strides = [1, 1]} : vector<16x32xf32> to vector<1x32xf32>
      %176 = tpu.concatenate %174, %175 in 0 : vector<1x32xf32>, vector<1x32xf32> -> vector<2x32xf32>
      %c0_67 = arith.constant 0 : index
      %c0_68 = arith.constant 0 : index
      %177 = vector.load %arg10[%c0_67, %c0_68] : memref<32x32xf32, #tpu.memory_space<vmem>>, vector<32x32xf32>
      %cst_69 = arith.constant dense<0.000000e+00> : vector<2x32xf32>
      %178 = tpu.matmul %176, %177, %cst_69 {dimension_numbers = #tpu.dot_dimension_numbers<[1], [0], [0], [1], [0, 0, 1, 1], [], []>} : vector<2x32xf32>, vector<32x32xf32>, vector<2x32xf32> -> vector<2x32xf32>
      %c0_70 = arith.constant 0 : index
      %c0_71 = arith.constant 0 : index
      %179 = vector.load %arg11[%c0_70, %c0_71] : memref<1x32xf32, #tpu.memory_space<vmem>>, vector<1x32xf32>
      %180 = vector.broadcast %179 : vector<1x32xf32> to vector<2x32xf32>
      %181 = arith.addf %178, %180 : vector<2x32xf32>
      %182 = math.tanh %181 : vector<2x32xf32>
      %c0_72 = arith.constant 0 : index
      %c0_73 = arith.constant 0 : index
      %183 = vector.load %arg12[%c0_72, %c0_73] : memref<32x32xf32, #tpu.memory_space<vmem>>, vector<32x32xf32>
      %cst_74 = arith.constant dense<0.000000e+00> : vector<2x32xf32>
      %184 = tpu.matmul %182, %183, %cst_74 {dimension_numbers = #tpu.dot_dimension_numbers<[1], [0], [0], [1], [0, 0, 1, 1], [], []>} : vector<2x32xf32>, vector<32x32xf32>, vector<2x32xf32> -> vector<2x32xf32>
      %c0_75 = arith.constant 0 : index
      %c0_76 = arith.constant 0 : index
      %185 = vector.load %arg13[%c0_75, %c0_76] : memref<1x32xf32, #tpu.memory_space<vmem>>, vector<1x32xf32>
      %186 = vector.broadcast %185 : vector<1x32xf32> to vector<2x32xf32>
      %187 = arith.addf %184, %186 : vector<2x32xf32>
      %cst_77 = arith.constant 0.000000e+00 : f32
      %188 = vector.broadcast %cst_77 : f32 to vector<2x32xf32>
      %189 = arith.maximumf %187, %188 : vector<2x32xf32>
      %c0_78 = arith.constant 0 : index
      %c0_79 = arith.constant 0 : index
      %190 = vector.load %arg14[%c0_78, %c0_79] : memref<32x3xf32, #tpu.memory_space<vmem>>, vector<32x3xf32>
      %cst_80 = arith.constant dense<0.000000e+00> : vector<2x3xf32>
      %191 = tpu.matmul %189, %190, %cst_80 {dimension_numbers = #tpu.dot_dimension_numbers<[1], [0], [0], [1], [0, 0, 1, 1], [], []>} : vector<2x32xf32>, vector<32x3xf32>, vector<2x3xf32> -> vector<2x3xf32>
      %c0_81 = arith.constant 0 : index
      %c0_82 = arith.constant 0 : index
      %192 = vector.load %arg15[%c0_81, %c0_82] : memref<1x3xf32, #tpu.memory_space<vmem>>, vector<1x3xf32>
      %193 = vector.broadcast %192 : vector<1x3xf32> to vector<2x3xf32>
      %194 = arith.addf %191, %193 : vector<2x3xf32>
      %c0_83 = arith.constant 0 : index
      %c0_84 = arith.constant 0 : index
      %195 = vector.load %arg18[%c0_83, %c0_84] : memref<2x3xf32, #tpu.memory_space<vmem>>, vector<2x3xf32>
      tpu.vector_store %arg18[%c0_83, %c0_84], %194 {strides = array<i32>} : memref<2x3xf32, #tpu.memory_space<vmem>>, vector<2x3xf32>,
      %cst_85 = arith.constant dense<0xFF800000> : vector<2xf32>
      %196 = vector.multi_reduction <maximumf>, %194, %cst_85 [1] : vector<2x3xf32> to vector<2xf32>
      %197 = vector.shape_cast %196 : vector<2xf32> to vector<2x1xf32>
      %198 = vector.broadcast %197 : vector<2x1xf32> to vector<2x3xf32>
      %199 = arith.subf %194, %198 : vector<2x3xf32>
      %200 = math.exp %199 : vector<2x3xf32>
      %cst_86 = arith.constant dense<0.000000e+00> : vector<2xf32>
      %201 = vector.multi_reduction <add>, %200, %cst_86 [1] : vector<2x3xf32> to vector<2xf32>
      %202 = vector.shape_cast %201 : vector<2xf32> to vector<2x1xf32>
      %203 = math.log %202 : vector<2x1xf32>
      %204 = vector.broadcast %203 : vector<2x1xf32> to vector<2x3xf32>
      %205 = arith.subf %199, %204 : vector<2x3xf32>
      %c0_87 = arith.constant 0 : index
      %c0_88 = arith.constant 0 : index
      %206 = vector.load %arg16[%c0_87, %c0_88] : memref<2x3xf32, #tpu.memory_space<vmem>>, vector<2x3xf32>
      %207 = arith.mulf %206, %205 : vector<2x3xf32>
      %cst_89 = arith.constant dense<0.000000e+00> : vector<2xf32>
      %208 = vector.multi_reduction <add>, %207, %cst_89 [1] : vector<2x3xf32> to vector<2xf32>
      %209 = vector.shape_cast %208 : vector<2xf32> to vector<2x1xf32>
      %cst_90 = arith.constant 0.000000e+00 : f32
      %210 = vector.broadcast %cst_90 : f32 to vector<2x1xf32>
      %211 = arith.subf %210, %209 : vector<2x1xf32>
      %cst_91 = arith.constant dense<0.000000e+00> : vector<1xf32>
      %212 = vector.multi_reduction <add>, %211, %cst_91 [0] : vector<2x1xf32> to vector<1xf32>
      %213 = vector.shape_cast %212 : vector<1xf32> to vector<1x1xf32>
      %cst_92 = arith.constant 5.000000e-01 : f32
      %214 = vector.broadcast %cst_92 : f32 to vector<1x1xf32>
      %215 = arith.mulf %213, %214 : vector<1x1xf32>
      %c0_93 = arith.constant 0 : index
      %c0_94 = arith.constant 0 : index
      %216 = vector.load %arg19[%c0_93, %c0_94] : memref<1x1xf32, #tpu.memory_space<vmem>>, vector<1x1xf32>
      tpu.vector_store %arg19[%c0_93, %c0_94], %215 {strides = array<i32>} : memref<1x1xf32, #tpu.memory_space<vmem>>, vector<1x1xf32>,
    } else {
    }
    return
  }
  func.func @transform_0(%arg0: i32) -> (i32, i32) {
    %c0_i32 = arith.constant 0 : i32
    %c0_i32_0 = arith.constant 0 : i32
    %c0_i32_1 = arith.constant 0 : i32
    return %c0_i32, %c0_i32_0 : i32, i32
  }
  func.func @transform_1(%arg0: i32) -> (i32, i32) {
    %c0_i32 = arith.constant 0 : i32
    %c0_i32_0 = arith.constant 0 : i32
    %c0_i32_1 = arith.constant 0 : i32
    return %c0_i32, %c0_i32_0 : i32, i32
  }
  func.func @transform_2(%arg0: i32) -> (i32, i32) {
    %c0_i32 = arith.constant 0 : i32
    %c0_i32_0 = arith.constant 0 : i32
    %c0_i32_1 = arith.constant 0 : i32
    return %c0_i32, %c0_i32_0 : i32, i32
  }
  func.func @transform_3(%arg0: i32) -> (i32, i32) {
    %c0_i32 = arith.constant 0 : i32
    %c0_i32_0 = arith.constant 0 : i32
    %c0_i32_1 = arith.constant 0 : i32
    return %c0_i32, %c0_i32_0 : i32, i32
  }
  func.func @transform_4(%arg0: i32) -> (i32, i32, i32, i32) {
    %c0_i32 = arith.constant 0 : i32
    %c0_i32_0 = arith.constant 0 : i32
    %c0_i32_1 = arith.constant 0 : i32
    %c0_i32_2 = arith.constant 0 : i32
    return %arg0, %c0_i32, %c0_i32_0, %c0_i32_1 : i32, i32, i32, i32
  }
  func.func @transform_5(%arg0: i32) -> (i32, i32, i32) {
    %c0_i32 = arith.constant 0 : i32
    %c0_i32_0 = arith.constant 0 : i32
    %c0_i32_1 = arith.constant 0 : i32
    return %arg0, %c0_i32, %c0_i32_0 : i32, i32, i32
  }
  func.func @transform_6(%arg0: i32) -> (i32, i32, i32) {
    %c0_i32 = arith.constant 0 : i32
    %c0_i32_0 = arith.constant 0 : i32
    %c0_i32_1 = arith.constant 0 : i32
    return %arg0, %c0_i32, %c0_i32_0 : i32, i32, i32
  }
  func.func @transform_7(%arg0: i32) -> (i32, i32, i32) {
    %c0_i32 = arith.constant 0 : i32
    %c0_i32_0 = arith.constant 0 : i32
    %c0_i32_1 = arith.constant 0 : i32
    return %arg0, %c0_i32, %c0_i32_0 : i32, i32, i32
  }
  func.func @transform_8(%arg0: i32) -> (i32, i32, i32) {
    %c0_i32 = arith.constant 0 : i32
    %c0_i32_0 = arith.constant 0 : i32
    %c0_i32_1 = arith.constant 0 : i32
    return %arg0, %c0_i32, %c0_i32_0 : i32, i32, i32
  }
  func.func @transform_9(%arg0: i32) -> (i32, i32) {
    %c0_i32 = arith.constant 0 : i32
    %c0_i32_0 = arith.constant 0 : i32
    %c0_i32_1 = arith.constant 0 : i32
    return %c0_i32, %c0_i32_0 : i32, i32
  }
  func.func @transform_10(%arg0: i32) -> (i32, i32) {
    %c0_i32 = arith.constant 0 : i32
    %c0_i32_0 = arith.constant 0 : i32
    %c0_i32_1 = arith.constant 0 : i32
    return %c0_i32, %c0_i32_0 : i32, i32
  }
  func.func @transform_11(%arg0: i32) -> (i32, i32) {
    %c0_i32 = arith.constant 0 : i32
    %c0_i32_0 = arith.constant 0 : i32
    %c0_i32_1 = arith.constant 0 : i32
    return %c0_i32, %c0_i32_0 : i32, i32
  }
  func.func @transform_12(%arg0: i32) -> (i32, i32) {
    %c0_i32 = arith.constant 0 : i32
    %c0_i32_0 = arith.constant 0 : i32
    %c0_i32_1 = arith.constant 0 : i32
    return %c0_i32, %c0_i32_0 : i32, i32
  }
  func.func @transform_13(%arg0: i32) -> (i32, i32) {
    %c0_i32 = arith.constant 0 : i32
    %c0_i32_0 = arith.constant 0 : i32
    %c0_i32_1 = arith.constant 0 : i32
    return %c0_i32, %c0_i32_0 : i32, i32
  }
  func.func @transform_14(%arg0: i32) -> (i32, i32) {
    %c0_i32 = arith.constant 0 : i32
    %c0_i32_0 = arith.constant 0 : i32
    %c0_i32_1 = arith.constant 0 : i32
    return %c0_i32, %c0_i32_0 : i32, i32
  }
  func.func @transform_15(%arg0: i32) -> (i32, i32) {
    %c0_i32 = arith.constant 0 : i32
    %c0_i32_0 = arith.constant 0 : i32
    %c0_i32_1 = arith.constant 0 : i32
    return %c0_i32, %c0_i32_0 : i32, i32
  }
  func.func @transform_16(%arg0: i32) -> (i32, i32) {
    %c0_i32 = arith.constant 0 : i32
    %c0_i32_0 = arith.constant 0 : i32
    %c0_i32_1 = arith.constant 0 : i32
    return %c0_i32, %c0_i32_0 : i32, i32
  }
  func.func @transform_17(%arg0: i32) -> (i32, i32) {
    %c0_i32 = arith.constant 0 : i32
    %c0_i32_0 = arith.constant 0 : i32
    %c0_i32_1 = arith.constant 0 : i32
    return %c0_i32, %c0_i32_0 : i32, i32
  }
  func.func @transform_18(%arg0: i32) -> (i32, i32) {
    %c0_i32 = arith.constant 0 : i32
    %c0_i32_0 = arith.constant 0 : i32
    %c0_i32_1 = arith.constant 0 : i32
    return %c0_i32, %c0_i32_0 : i32, i32
  }
}

</mosaic_0001>

<bundles_post_ra>
// kernel: bert_classifier_forward.1
= control target key start
LH: loop header
LB: loop body
LE: loop exit
PB: predicated region body
PF: predicated region fallthrough
CT: control target
= control target key end

     0   :  { %s3811_s0 = inlined_call_operand.vmem [shape: f32[16,32], index: 0, kind: input, shape index: {}]   ;;  %s3812_s1 = inlined_call_operand.vmem [shape: f32[16,16], index: 1, kind: input, shape index: {}]   ;;  %s3813_s2 = inlined_call_operand.vmem [shape: f32[1,32], index: 2, kind: input, shape index: {}]   ;;  %s3814_s3 = inlined_call_operand.vmem [shape: f32[1,32], index: 3, kind: input, shape index: {}]   ;;  %s3815_s4 = inlined_call_operand.vmem [shape: f32[2,3,32,32], index: 4, kind: input, shape index: {}]   ;;  %s3816_s5 = inlined_call_operand.vmem [shape: f32[2,32,32], index: 5, kind: input, shape index: {}]   ;;  %s3817_s6 = inlined_call_operand.vmem [shape: f32[2,32,64], index: 6, kind: input, shape index: {}]   ;;  %s3818_s7 = inlined_call_operand.vmem [shape: f32[2,64,32], index: 7, kind: input, shape index: {}]   ;;  %s3819_s8 = inlined_call_operand.vmem [shape: f32[2,16,128], index: 8, kind: input, shape index: {}]   ;;  %s3820_s9 = inlined_call_operand.vmem [shape: f32[32,32], index: 9, kind: input, shape index: {}]   ;;  %s3821_s10 = inlined_call_operand.vmem [shape: f32[1,32], index: 10, kind: input, shape index: {}]   ;;  %s3822_s11 = inlined_call_operand.vmem [shape: f32[32,32], index: 11, kind: input, shape index: {}]   ;;  %s3823_s12 = inlined_call_operand.vmem [shape: f32[1,32], index: 12, kind: input, shape index: {}]   ;;  %s3824_s13 = inlined_call_operand.vmem [shape: f32[32,3], index: 13, kind: input, shape index: {}]   ;;  %s3825_s14 = inlined_call_operand.vmem [shape: f32[1,3], index: 14, kind: input, shape index: {}]   ;;  %s3826_s15 = inlined_call_operand.vmem [shape: f32[2,3], index: 15, kind: input, shape index: {}]   ;;  %s3827_s16 = inlined_call_operand.hbm [shape: f32[16,32], index: 16, kind: output, shape index: {0}]   ;;  %s3828_s17 = inlined_call_operand.hbm [shape: f32[2,3], index: 17, kind: output, shape index: {1}]   ;;  %s3829_s18 = inlined_call_operand.hbm [shape: f32[1,1], index: 18, kind: output, shape index: {2}]  }
   0x1   :  { %3836 = sst [smem:[#allocation10_spill]] %s3811_s0 }
   0x2   :  { %3837 = sst [smem:[#allocation11_spill]] %s3812_s1 }
   0x3   :  { %3838 = sst [smem:[#allocation12_spill]] %s3813_s2 }
   0x4   :  { %3839 = sst [smem:[#allocation13_spill]] %s3816_s5 }
   0x5   :  { %3840 = sst [smem:[#allocation14_spill]] %s3827_s16 }
   0x6   :  { %3841 = sst [smem:[#allocation15_spill]] %s3828_s17 }
   0x7   :  { %3842 = sst [smem:[#allocation16_spill]] %s3829_s18 }
   0x8   :  { %24 = vsyncpa [#allocation3], 0 }
   0x9   :  { %25 = vsyncpa [#allocation5], 0  ;;  %s3418_s27 = smov 0  }
   0xa LB: > { %3843 = sst [smem:[#allocation9_spill]] %s3308_s27  ;;  %s3424_s28 = sadd.s32 4294967295, %s3308_s27   ;;  %s3308_s27 = sphi %s3418_s27, %s31_s27  }
   0xb   : > { %p2640_p0 = scmp.ge.s32.totalorder %s3308_s27, 1  ;;  %p544_p1 = scmp.lt.s32.totalorder %s3308_s27, 3 }
   0xd   : > { %p545_p2 = pnand %p2640_p0, %p544_p1 }
   0xe   : > { %p613_p3 = scmp.lt.s32.totalorder (!%p545_p2), %s3424_s28, 1  ;;  %s3844_s5 = sld [smem:[#allocation13_spill]] (!%p545_p2) }
   0xf   : > { %548 = sbr.rel (%p545_p2) target bundleno = 5227 (0x146b), region = 84  ;;  %p2650_p4 = scmp.ne.s32.totalorder (!%p545_p2), %s3424_s28, 0 }
  0x16   : > { %s614_s29 = scalar_select %p613_p3, %s3424_s28, 1 }
  0x17   : > { %641 = sbr.rel (%p2650_p4) target bundleno = 363 (0x16b), region = 88  ;;  %s3845_s22 = sld [smem:[#allocation10_spill]] (!%p2650_p4)  ;;  %vm646_vm0 = vcmask (!%p2650_p4), 261120   ;;  %v2652_v33 = vld [vmem:[%s3814_s3] ss:$0 sm:$0xff] (!%p2650_p4) }
  0x18   : > { %s3080_s30 = smul.u32 96, %s614_s29  ;;  %s2712_s0 = sshll.u32 %s614_s29, 5 }
  0x19   : > { %s3433_s20 = scalar_lea.vmem %s3844_s5, %s2712_s0  ;;  %s3438_s2 = scalar_lea.vmem %s3817_s6, %s2712_s0 }
  0x1a   : > { %s3443_s25 = scalar_lea.vmem %s3815_s4, %s3080_s30  ;;  %s2714_s26 = sshll.u32 %s614_s29, 6 }
  0x1b   : > { %s3448_s16 = scalar_lea.vmem %s3818_s7, %s2714_s26  ;;  %s2715_s17 = sshll.u32 %s614_s29, 4 }
  0x1c   : > { %s3453_s5 = scalar_lea.vmem %s3819_s8, %s2715_s17  ;;  %s3846_s27 = sld [smem:[#allocation12_spill]] (!%p2650_p4) }
  0x1d   : > { %v642_v0 = vld [vmem:[%s3845_s22] sm:$0xff] (!%p2650_p4)  ;;  %v643_v1 = vld [vmem:[%s3845_s22 + $0x8] sm:$0xff] (!%p2650_p4) }
  0x1e   : > { %v647_v2 = vsel %vm646_vm0, %v642_v0, 0.0  ;;  %v650_v3 = vsel %vm646_vm0, %v643_v1, 0.0 }
  0x1f   : > { %648 = vadd.xlane.f32.xlu0 %v647_v2 }
  0x22   : > { %v2651_v31 = vld [vmem:[%s3846_s27] ss:$0 sm:$0xff] }
  0x23   : > { %651 = vadd.xlane.f32.xlu0 %v650_v3 }
  0xac   : > { %v649_v4 = vpop.xlane.xlu0 %648 }
  0xad   : > { %v654_v5 = vmul.f32 0.03125, %v649_v4 }
  0xaf   : > { %v656_v6 = vsub.f32 %v642_v0, %v654_v5 }
  0xb0   : > { %v652_v7 = vpop.xlane.xlu0 %651 }
  0xb1   : > { %v655_v8 = vmul.f32 0.03125, %v652_v7  ;;  %v658_v9 = vmul.f32 %v656_v6, %v656_v6 }
  0xb3   : > { %v657_v10 = vsub.f32 %v643_v1, %v655_v8  ;;  %v660_v11 = vsel %vm646_vm0, %v658_v9, 0.0 }
  0xb4   : > { %661 = vadd.xlane.f32.xlu1 %v660_v11 }
  0xb5   : > { %v659_v12 = vmul.f32 %v657_v10, %v657_v10 }
  0xb7   : > { %v663_v13 = vsel %vm646_vm0, %v659_v12, 0.0 }
  0xb8   : > { %664 = vadd.xlane.f32.xlu1 %v663_v13 }
 0x141   : > { %v662_v14 = vpop.xlane.xlu1 %661 }
 0x142   : > { %v666_v15 = vmul.f32 0.032258064, %v662_v14 }
 0x144   : > { %3120 = vrsqrt.f32 %v666_v15  ;;  %vm670_vm1 = vcmp.eq.f32.partialorder %v666_v15, inf  ;;  %v673_v20 = vand.u32 2147483648, %v666_v15  ;;  %vm672_vm2 = vcmp.eq.f32.partialorder %v666_v15, 0.0 }
 0x145   : > { %v665_v16 = vpop.xlane.xlu1 %664 }
 0x146   : > { %v667_v17 = vmul.f32 0.032258064, %v665_v16 }
 0x148   : > { %3122 = vrsqrt.f32 %v667_v17  ;;  %vm677_vm3 = vcmp.eq.f32.partialorder %v667_v17, inf  ;;  %v680_v26 = vand.u32 2147483648, %v667_v17  ;;  %vm679_vm4 = vcmp.eq.f32.partialorder %v667_v17, 0.0 }
 0x14e   : > { %v3121_v18 = vpop.eup %3120 }
 0x14f   : > { %v669_v19 = vmul.f32 %v3121_v18, %v666_v15 }
 0x151   : > { %v671_v21 = vsel %vm670_vm1, %v666_v15, %v669_v19 }
 0x152   : > { %v3123_v22 = vpop.eup %3122  ;;  %v674_v23 = vsel %vm672_vm2, %v673_v20, %v671_v21 }
 0x153   : > { %v682_v24 = vadd.f32 1e-06, %v674_v23  ;;  %v676_v25 = vmul.f32 %v3123_v22, %v667_v17 }
 0x155   : > { %3124 = vrcp.f32 %v682_v24  ;;  %v678_v27 = vsel %vm677_vm3, %v667_v17, %v676_v25 }
 0x156   : > { %v681_v28 = vsel %vm679_vm4, %v680_v26, %v678_v27 }
 0x157   : > { %v683_v29 = vadd.f32 1e-06, %v681_v28 }
 0x159   : > { %3126 = vrcp.f32 %v683_v29 }
 0x15f   : > { %v3125_v30 = vpop.eup %3124 }
 0x160   : > { %v685_v32 = vmul.f32 %v3125_v30, %v656_v6 }
 0x162   : > { %v694_v34 = vmul.f32 %v2651_v31, %v685_v32 }
 0x163   : > { %v3127_v35 = vpop.eup %3126 }
 0x164   : > { %v702_v36 = vadd.f32 %v2652_v33, %v694_v34  ;;  %v687_v37 = vmul.f32 %v3127_v35, %v657_v10 }
 0x166   : > { %704 = vst.msk [vmem:[#allocation2] sm:$0xff] %vm646_vm0, %v702_v36  ;;  %v695_v38 = vmul.f32 %v2651_v31, %v687_v37 }
 0x168   : > { %v703_v39 = vadd.f32 %v2652_v33, %v695_v38 }
 0x16a   : > { %705 = vst.msk [vmem:[#allocation2 + $0x8] sm:$0xff] %vm646_vm0, %v703_v39 }
 0x16b PF: > { %v710_v40 = vld [vmem:[%s3443_s25] sm:$0xff]  ;;  %v711_v41 = vld [vmem:[%s3443_s25 + $0x8] sm:$0xff]  ;;  %v712_v42 = vld [vmem:[%s3443_s25 + $0x10] sm:$0xff]  ;;  %vm718_vm5 = vcmask 261120   ;;  %v714_v54 = vlaneseq  ;;  %vm970_vm6 = vcmask 64512   ;;  %s3310_s26 = smov 120  }
 0x16c   : > { %v2966_v43 = vpack.c.bf16 %v711_v41, %v710_v40  ;;  %v713_v44 = vld [vmem:[%s3443_s25 + $0x18] sm:$0xff]  ;;  %v2655_v47 = vld [vmem:[%s3443_s25 + $0x20] sm:$0xff]  ;;  %v2656_v48 = vld [vmem:[%s3443_s25 + $0x28] sm:$0xff]  ;;  %s3849_s1 = sld [smem:[#allocation11_spill]]  ;;  %vm1062_vm8 = vcmask 130048   ;;  %s3311_s30 = smov 112  }
 0x16d   : > { %v3478_v45 = vld [vmem:[#allocation2] sm:$0xff]  ;;  %v2970_v46 = vpack.c.bf16 %v713_v44, %v712_v42  ;;  %v2974_v49 = vpack.c.bf16 %v2656_v48, %v2655_v47  ;;  %v2657_v50 = vld [vmem:[%s3443_s25 + $0x30] sm:$0xff]  ;;  %v2658_v51 = vld [vmem:[%s3443_s25 + $0x38] sm:$0xff]  ;;  %v3496_v55 = vshrl.u32 %v714_v54, 7  ;;  %s3312_s23 = smov 104   ;;  %s3313_s17 = smov 8  }
 0x16e   : > { %2811 = vmatprep.mubr.msk.f32.mxu1 %vm718_vm5, %v3478_v45  ;;  %2833 = vmatprep.mubr.msk.f32.mxu0 %vm718_vm5, %v3478_v45  ;;  %v2978_v53 = vpack.c.bf16 %v2658_v51, %v2657_v50  ;;  %v3500_v57 = vld [vmem:[%s3453_s5] sm:$0xff]  ;;  %vm3519_vm7 = vmpackc.low %vm970_vm6, %vm970_vm6  ;;  %v2662_v9 = vld [vmem:[%s3443_s25 + $0x48] sm:$0xff]  ;;  %s3314_s18 = smov 16   ;;  %s3315_s27 = smov 24   ;;  %vm1808_vm9 = vcmask 195584   ;;  %vm2066_vm14 = vcmask 523264  }
 0x16f   : > { %2967 = vmatprep.subr.bf16.mxu1 %v2966_v43  ;;  %v716_v56 = vsub.s32 0, %v3496_v55  ;;  %v807_v62 = vsub.s32 1, %v3496_v55  ;;  %v2661_v8 = vld [vmem:[%s3443_s25 + $0x40] sm:$0xff]  ;;  %v2663_v10 = vld [vmem:[%s3443_s25 + $0x50] sm:$0xff]  ;;  %v2664_v12 = vld [vmem:[%s3443_s25 + $0x58] sm:$0xff]  ;;  %v891_v50 = vsub.s32 2, %v3496_v55 }
 0x170   : > { %2969 = vmatpush3.bf16.msra.mxu1 %v2966_v43  ;;  %v2982_v11 = vpack.c.bf16 %v2662_v9, %v2661_v8  ;;  %v2986_v13 = vpack.c.bf16 %v2664_v12, %v2663_v10  ;;  %p2697_p5 = scmp.ne.s32.totalorder %s3424_s28, 1 }
 0x171   : > { %2971 = vmatprep.subr.bf16.mxu1 %v2970_v46  ;;  %v3488_v52 = vld [vmem:[#allocation2 + $0x8] sm:$0xff]  ;;  %v717_v58 = vrot.slane %v3500_v57, %v716_v56  ;;  %v808_v0 = vrot.slane %v3500_v57, %v807_v62  ;;  %v892_v51 = vrot.slane %v3500_v57, %v891_v50  ;;  %vm3317_vm3 = vmmov (!%p2697_p5), 0  }
 0x172   : > { %2983 = vmatprep.subr.bf16.mxu0 %v2982_v11  ;;  %v3550_v21 = vld [vmem:[%s3849_s1 + $0x8] sm:$0xff]  ;;  %v3555_v24 = vld [vmem:[%s3849_s1] sm:$0xff]  ;;  %vm2211_vm4 = vcmask (!%p2697_p5), 1040384  }
 0x173   : > { %2985 = vmatpush3.bf16.msra.mxu0 %v2982_v11 }
 0x174   : > { %2973 = vmatpush3.bf16.msra.mxu1 %v2970_v46  ;;  %2987 = vmatprep.subr.bf16.mxu0 %v2986_v13 }
 0x175   : > { %2975 = vmatprep.subr.bf16.mxu1 %v2974_v49 }
 0x177   : > { %2812 = vmatmul.mubr.msk.f32.vlgmr.msra.gmra.mrb[0].mxu1 %vm718_vm5, %v3488_v52  ;;  %2989 = vmatpush3.bf16.msra.mxu0 %v2986_v13 }
 0x178   : > { %2977 = vmatpush3.bf16.msra.mxu1 %v2974_v49  ;;  %2822 = vmatprep.mubr.msk.f32.mxu1 %vm718_vm5, %v3478_v45 }
 0x179   : > { %2979 = vmatprep.subr.bf16.mxu1 %v2978_v53 }
 0x17a   : > { %2834 = vmatmul.mubr.msk.f32.vlgmr.msra.gmra.mrb[0].mxu0 %vm718_vm5, %v3488_v52 }
 0x17c   : > { %2981 = vmatpush3.bf16.msra.mxu1 %v2978_v53 }
 0x17f   : > { %2823 = vmatmul.mubr.msk.f32.vlgmr.msra.gmra.mrb[2].mxu1 %vm718_vm5, %v3488_v52 }
 0x24a   : > { %v2813_v59 = vpop.f32.mrb[0].mxu1 }
 0x24b   : > { %v3505_v60 = vadd.f32 %v2813_v59, %v717_v58  ;;  %v791_v61 = vpop.f32.mrb[1].mxu1 }
 0x24c   : > { %v3508_v63 = vadd.f32 %v791_v61, %v717_v58 }
 0x24d   : > { %1168 = vrot.lane.b32.xlu1 %v3505_v60, %s3310_s26  ;;  %v2835_v44 = vpop.f32.mrb[0].mxu0 }
 0x24e   : > { %2840 = vmatprep.mubr.msk.f32.mxu1 %vm970_vm6, %v3508_v63  ;;  %v965_v53 = vadd.f32 %v2835_v44, %v892_v51  ;;  %v959_v54 = vpop.f32.mrb[1].mxu0 }
 0x24f   : > { %v960_v58 = vadd.f32 %v959_v54, %v892_v51 }
 0x251   : > { %v3569_v59 = vpack.i.bf16 %v965_v53, %v960_v58  ;;  %v2996_v61 = vpack.c.bf16 %v965_v53, %v960_v58 }
 0x252   : > { %v2824_v1 = vpop.f32.mrb[2].mxu1 }
 0x253   : > { %v881_v2 = vadd.f32 %v2824_v1, %v808_v0  ;;  %v875_v3 = vpop.f32.mrb[3].mxu1  ;;  %2997 = vmatprep.subr.bf16.mxu0 %v2996_v61 }
 0x254   : > { %v876_v4 = vadd.f32 %v875_v3, %v808_v0  ;;  %2999 = vmatpush3.bf16.msra.mxu0 %v2996_v61 }
 0x256   : > { %v3523_v6 = vpack.i.bf16 %v881_v2, %v876_v4  ;;  %v2990_v7 = vpack.c.bf16 %v881_v2, %v876_v4 }
 0x258   : > { %3129 = vrot.lane.b32.xlu0 %v3523_v6, %s3310_s26  ;;  %2992 = vmatprep.subr.msk.bf16.mxu1 %vm3519_vm7, %v2990_v7 }
 0x259   : > { %2995 = vmatpush3.bf16.xpose.msk.msra.mxu1 %vm3519_vm7, %v2990_v7 }
 0x25c   : > { %1166 = vrot.lane.b32.xlu0 %v3508_v63, %s3310_s26 }
 0x260   : > { %2841 = vmatmul.mubr.msk.f32.vlgmr.msra.gmra.mrb[4].mxu1 %vm970_vm6, %v3505_v60 }
 0x2bf   : > { %v1169_v19 = vpop.permute.xlu1 %1168 }
 0x2ca   : > { %v3130_v14 = vpop.permute.xlu0 %3129 }
 0x2cb   : > { %v3132_v15 = vunpack.i.h.bf16 %v3130_v14  ;;  %v3131_v16 = vunpack.i.l.bf16 %v3130_v14 }
 0x2cd   : > { %v3000_v17 = vpack.c.bf16 %v3132_v15, %v3131_v16 }
 0x2ce   : > { %v1167_v18 = vpop.permute.xlu0 %1166 }
 0x2cf   : > { %3002 = vmatprep.subr.msk.bf16.mxu1 %vm3519_vm7, %v3000_v17  ;;  %2854 = vmatprep.mubr.msk.f32.mxu1 %vm970_vm6, %v1167_v18 }
 0x2d0   : > { %3005 = vmatpush3.bf16.xpose.msk.msra.mxu1 %vm3519_vm7, %v3000_v17 }
 0x2d7   : > { %2855 = vmatmul.mubr.msk.f32.vlgmr.msra.gmra.mrb[6].mxu1 %vm970_vm6, %v1169_v19 }
 0x333   : > { %v2842_v20 = vpop.f32.mrb[4].mxu1 }
 0x334   : > { %v1059_v22 = vmul.f32 0.35355338, %v2842_v20  ;;  %v1049_v23 = vpop.f32.mrb[5].mxu1 }
 0x335   : > { %v1058_v25 = vmul.f32 0.35355338, %v1049_v23 }
 0x336   : > { %v1061_v26 = vadd.f32 %v1059_v22, %v3550_v21 }
 0x337   : > { %v1060_v27 = vadd.f32 %v1058_v25, %v3555_v24 }
 0x338   : > { %v1066_v28 = vsel %vm1062_vm8, %v1061_v26, -inf }
 0x339   : > { %1067 = vmax.xlane.f32.xlu0 %v1066_v28  ;;  %v1063_v29 = vsel %vm1062_vm8, %v1060_v27, -inf }
 0x33a   : > { %1064 = vmax.xlane.f32.xlu1 %v1063_v29 }
 0x3aa   : > { %v2856_v30 = vpop.f32.mrb[6].mxu1 }
 0x3ab   : > { %v1258_v31 = vmul.f32 0.35355338, %v2856_v30  ;;  %v1248_v32 = vpop.f32.mrb[7].mxu1 }
 0x3ac   : > { %v1257_v33 = vmul.f32 0.35355338, %v1248_v32 }
 0x3ad   : > { %v1260_v34 = vadd.f32 %v1258_v31, %v3550_v21 }
 0x3ae   : > { %v1259_v35 = vadd.f32 %v1257_v33, %v3555_v24 }
 0x3af   : > { %v1264_v36 = vsel %vm1062_vm8, %v1260_v34, -inf }
 0x3b0   : > { %1265 = vmax.xlane.f32.xlu1 %v1264_v36  ;;  %v1261_v37 = vsel %vm1062_vm8, %v1259_v35, -inf }
 0x3b1   : > { %1262 = vmax.xlane.f32.xlu0 %v1261_v37 }
 0x3c6   : > { %v1068_v38 = vpop.xlane.xlu0 %1067 }
 0x3c7   : > { %v1070_v39 = vsub.f32 %v1061_v26, %v1068_v38  ;;  %v1065_v40 = vpop.xlane.xlu1 %1064 }
 0x3c8   : > { %v1069_v41 = vsub.f32 %v1060_v27, %v1065_v40 }
 0x3c9   : > { %v1073_v42 = vmul.f32 1.442695, %v1070_v39 }
 0x3ca   : > { %v1071_v43 = vmul.f32 1.442695, %v1069_v41 }
 0x3cb   : > { %3158 = vpow2.f32 %v1073_v42 }
 0x3cc   : > { %3160 = vpow2.f32 %v1071_v43 }
 0x3d5   : > { %v3159_v46 = vpop.eup %3158 }
 0x3d6   : > { %v3161_v47 = vpop.eup %3160  ;;  %v1078_v48 = vsel %vm1062_vm8, %v3159_v46, 0.0 }
 0x3d7   : > { %1079 = vadd.xlane.f32.xlu1 %v1078_v48  ;;  %v1075_v49 = vsel %vm1062_vm8, %v3161_v47, 0.0 }
 0x3d8   : > { %1076 = vadd.xlane.f32.xlu0 %v1075_v49 }
 0x43d   : > { %v1266_v0 = vpop.xlane.xlu1 %1265 }
 0x43e   : > { %v1268_v1 = vsub.f32 %v1260_v34, %v1266_v0  ;;  %v1263_v2 = vpop.xlane.xlu0 %1262 }
 0x43f   : > { %v1267_v3 = vsub.f32 %v1259_v35, %v1263_v2 }
 0x440   : > { %v1271_v4 = vmul.f32 1.442695, %v1268_v1 }
 0x441   : > { %v1269_v7 = vmul.f32 1.442695, %v1267_v3 }
 0x442   : > { %3162 = vpow2.f32 %v1271_v4 }
 0x443   : > { %3164 = vpow2.f32 %v1269_v7 }
 0x44c   : > { %v3163_v8 = vpop.eup %3162 }
 0x44d   : > { %v3165_v9 = vpop.eup %3164  ;;  %v1276_v10 = vsel %vm1062_vm8, %v3163_v8, 0.0 }
 0x44e   : > { %1277 = vadd.xlane.f32.xlu1 %v1276_v10  ;;  %v1273_v11 = vsel %vm1062_vm8, %v3165_v9, 0.0 }
 0x44f   : > { %1274 = vadd.xlane.f32.xlu0 %v1273_v11 }
 0x45f   : > { %3139 = vrot.lane.b32.xlu1 %v3523_v6, %s3311_s30 }
 0x463   : > { %1372 = vrot.lane.b32.xlu1 %v3508_v63, %s3311_s30 }
 0x464   : > { %v1080_v12 = vpop.xlane.xlu1 %1079 }
 0x465   : > { %3166 = vrcp.f32 %v1080_v12  ;;  %3134 = vrot.lane.b32.xlu0 %v3569_v59, %s3310_s26  ;;  %v1077_v13 = vpop.xlane.xlu0 %1076 }
 0x466   : > { %3168 = vrcp.f32 %v1077_v13 }
 0x469   : > { %1374 = vrot.lane.b32.xlu0 %v3505_v60, %s3311_s30 }
 0x46f   : > { %v3167_v14 = vpop.eup %3166 }
 0x470   : > { %v3169_v15 = vpop.eup %3168  ;;  %v1084_v17 = vmul.f32 %v3167_v14, %v3159_v46 }
 0x471   : > { %v1082_v16 = vmul.f32 %v3169_v15, %v3161_v47 }
 0x473   : > { %2847 = vmatprep.mubr.msk.f32.mxu0 %vm1062_vm8, %v1082_v16 }
 0x474   : > { %2848 = vmatmul.mubr.msk.f32.vlgmr.msra.gmra.mrb[2].mxu0 %vm1062_vm8, %v1084_v17 }
 0x4db   : > { %v1278_v18 = vpop.xlane.xlu1 %1277 }
 0x4dc   : > { %3170 = vrcp.f32 %v1278_v18  ;;  %v1275_v19 = vpop.xlane.xlu0 %1274 }
 0x4dd   : > { %3172 = vrcp.f32 %v1275_v19 }
 0x4df   : > { %v3140_v20 = vpop.permute.xlu1 %3139 }
 0x4e0   : > { %v3135_v22 = vpop.permute.xlu0 %3134  ;;  %v3142_v23 = vunpack.i.h.bf16 %v3140_v20  ;;  %v3141_v25 = vunpack.i.l.bf16 %v3140_v20 }
 0x4e1   : > { %v3137_v26 = vunpack.i.h.bf16 %v3135_v22  ;;  %v3136_v27 = vunpack.i.l.bf16 %v3135_v22 }
 0x4e2   : > { %v3010_v29 = vpack.c.bf16 %v3142_v23, %v3141_v25 }
 0x4e3   : > { %v3006_v28 = vpack.c.bf16 %v3137_v26, %v3136_v27  ;;  %v1373_v34 = vpop.permute.xlu1 %1372 }
 0x4e4   : > { %v1375_v35 = vpop.permute.xlu0 %1374 }
 0x4e5   : > { %3007 = vmatprep.subr.bf16.mxu0 %v3006_v28 }
 0x4e6   : > { %v3171_v30 = vpop.eup %3170  ;;  %3009 = vmatpush3.bf16.msra.mxu0 %v3006_v28 }
 0x4e7   : > { %v3173_v31 = vpop.eup %3172  ;;  %3012 = vmatprep.subr.msk.bf16.mxu0 %vm3519_vm7, %v3010_v29  ;;  %v1282_v33 = vmul.f32 %v3171_v30, %v3163_v8 }
 0x4e8   : > { %v1280_v32 = vmul.f32 %v3173_v31, %v3165_v9 }
 0x4ea   : > { %2861 = vmatprep.mubr.msk.f32.mxu0 %vm1062_vm8, %v1280_v32 }
 0x4eb   : > { %2862 = vmatmul.mubr.msk.f32.vlgmr.msra.gmra.mrb[4].mxu0 %vm1062_vm8, %v1282_v33 }
 0x4ec   : > { %2868 = vmatprep.mubr.msk.f32.mxu0 %vm970_vm6, %v1373_v34 }
 0x4ef   : > { %3015 = vmatpush3.bf16.xpose.msk.msra.mxu0 %vm3519_vm7, %v3010_v29 }
 0x4f6   : > { %2869 = vmatmul.mubr.msk.f32.vlgmr.msra.gmra.mrb[6].mxu0 %vm970_vm6, %v1375_v35 }
 0x547   : > { %v3591_v36 = vpop.f32.mrb[2].mxu0 }
 0x548   : > { %v3593_v37 = vpop.f32.mrb[3].mxu0 }
 0x5be   : > { %v3595_v38 = vpop.f32.mrb[4].mxu0 }
 0x5bf   : > { %v3597_v39 = vpop.f32.mrb[5].mxu0 }
 0x5c9   : > { %v2870_v40 = vpop.f32.mrb[6].mxu0 }
 0x5ca   : > { %v1464_v41 = vmul.f32 0.35355338, %v2870_v40  ;;  %v1454_v42 = vpop.f32.mrb[7].mxu0 }
 0x5cb   : > { %v1463_v43 = vmul.f32 0.35355338, %v1454_v42 }
 0x5cc   : > { %v1466_v44 = vadd.f32 %v1464_v41, %v3550_v21 }
 0x5cd   : > { %v1465_v46 = vadd.f32 %v1463_v43, %v3555_v24 }
 0x5ce   : > { %v1470_v47 = vsel %vm1062_vm8, %v1466_v44, -inf }
 0x5cf   : > { %1471 = vmax.xlane.f32.xlu0 %v1470_v47  ;;  %v1467_v48 = vsel %vm1062_vm8, %v1465_v46, -inf }
 0x5d0   : > { %1468 = vmax.xlane.f32.xlu1 %v1467_v48 }
 0x65c   : > { %v1472_v49 = vpop.xlane.xlu0 %1471 }
 0x65d   : > { %v1474_v50 = vsub.f32 %v1466_v44, %v1472_v49  ;;  %v1469_v51 = vpop.xlane.xlu1 %1468  ;;  %v1811_v49 = vld [vmem:[%s3433_s20] sm:$0xff] }
 0x65e   : > { %v1473_v53 = vsub.f32 %v1465_v46, %v1469_v51  ;;  %v1813_v51 = vld [vmem:[%s3433_s20 + $0x10] sm:$0xff] }
 0x65f   : > { %v1477_v54 = vmul.f32 1.442695, %v1474_v50  ;;  %v1812_v50 = vld [vmem:[%s3433_s20 + $0x8] sm:$0xff] }
 0x660   : > { %v1475_v58 = vmul.f32 1.442695, %v1473_v53  ;;  %v3030_v53 = vpack.c.bf16 %v1812_v50, %v1811_v49 }
 0x661   : > { %3174 = vpow2.f32 %v1477_v54  ;;  %v1814_v54 = vld [vmem:[%s3433_s20 + $0x18] sm:$0xff] }
 0x662   : > { %3176 = vpow2.f32 %v1475_v58  ;;  %v3034_v58 = vpack.c.bf16 %v1814_v54, %v1813_v51  ;;  %v1945_v51 = vsub.s32 4, %v3496_v55 }
 0x664   : > { %v1946_v54 = vrot.slane %v3500_v57, %v1945_v51 }
 0x66b   : > { %v3175_v61 = vpop.eup %3174 }
 0x66c   : > { %v3177_v0 = vpop.eup %3176  ;;  %v1482_v1 = vsel %vm1062_vm8, %v3175_v61, 0.0 }
 0x66d   : > { %1483 = vadd.xlane.f32.xlu1 %v1482_v1  ;;  %v1479_v2 = vsel %vm1062_vm8, %v3177_v0, 0.0 }
 0x66e   : > { %1480 = vadd.xlane.f32.xlu0 %v1479_v2 }
 0x67e   : > { %3149 = vrot.lane.b32.xlu1 %v3523_v6, %s3312_s23 }
 0x682   : > { %1576 = vrot.lane.b32.xlu1 %v3508_v63, %s3312_s23 }
 0x684   : > { %3144 = vrot.lane.b32.xlu0 %v3569_v59, %s3311_s30 }
 0x688   : > { %1578 = vrot.lane.b32.xlu0 %v3505_v60, %s3312_s23 }
 0x6fa   : > { %v1484_v3 = vpop.xlane.xlu1 %1483 }
 0x6fb   : > { %3178 = vrcp.f32 %v1484_v3  ;;  %v1481_v4 = vpop.xlane.xlu0 %1480 }
 0x6fc   : > { %3180 = vrcp.f32 %v1481_v4 }
 0x6fe   : > { %v3150_v7 = vpop.permute.xlu1 %3149 }
 0x6ff   : > { %v3145_v8 = vpop.permute.xlu0 %3144  ;;  %v3152_v9 = vunpack.i.h.bf16 %v3150_v7  ;;  %v3151_v10 = vunpack.i.l.bf16 %v3150_v7 }
 0x700   : > { %v3147_v11 = vunpack.i.h.bf16 %v3145_v8  ;;  %v3146_v12 = vunpack.i.l.bf16 %v3145_v8 }
 0x701   : > { %v3020_v13 = vpack.c.bf16 %v3152_v9, %v3151_v10 }
 0x702   : > { %v3016_v6 = vpack.c.bf16 %v3147_v11, %v3146_v12  ;;  %v1577_v16 = vpop.permute.xlu1 %1576 }
 0x703   : > { %v1579_v17 = vpop.permute.xlu0 %1578 }
 0x704   : > { %3017 = vmatprep.subr.bf16.mxu1 %v3016_v6 }
 0x705   : > { %v3179_v63 = vpop.eup %3178  ;;  %3019 = vmatpush3.bf16.msra.mxu1 %v3016_v6 }
 0x706   : > { %v3181_v14 = vpop.eup %3180  ;;  %3022 = vmatprep.subr.msk.bf16.mxu1 %vm3519_vm7, %v3020_v13  ;;  %v1488_v15 = vmul.f32 %v3179_v63, %v3175_v61  ;;  %v1817_v63 = vsub.s32 3, %v3496_v55 }
 0x707   : > { %v1486_v60 = vmul.f32 %v3181_v14, %v3177_v0 }
 0x708   : > { %v1818_v14 = vrot.slane %v3500_v57, %v1817_v63  ;;  %v2058_v63 = vld [vmem:[%s3448_s16 + $0x20] sm:$0xff] }
 0x709   : > { %2875 = vmatprep.mubr.msk.f32.mxu1 %vm1062_vm8, %v1486_v60 }
 0x70a   : > { %2876 = vmatmul.mubr.msk.f32.vlgmr.msra.gmra.mrb[8].mxu1 %vm1062_vm8, %v1488_v15 }
 0x70b   : > { %2882 = vmatprep.mubr.msk.f32.mxu1 %vm970_vm6, %v1577_v16 }
 0x70e   : > { %3025 = vmatpush3.bf16.xpose.msk.msra.mxu1 %vm3519_vm7, %v3020_v13  ;;  %vm2496_vm7 = vcmask (!%p2697_p5), 0  }
 0x715   : > { %2883 = vmatmul.mubr.msk.f32.vlgmr.msra.gmra.mrb[10].mxu1 %vm970_vm6, %v1579_v17 }
 0x7dd   : > { %v2877_v18 = vpop.f32.mrb[8].mxu1 }
 0x7de   : > { %v1567_v19 = vpop.f32.mrb[9].mxu1 }
 0x7e8   : > { %v2884_v20 = vpop.f32.mrb[10].mxu1 }
 0x7e9   : > { %v1668_v22 = vmul.f32 0.35355338, %v2884_v20  ;;  %v1658_v23 = vpop.f32.mrb[11].mxu1 }
 0x7ea   : > { %v1667_v25 = vmul.f32 0.35355338, %v1658_v23 }
 0x7eb   : > { %v1670_v26 = vadd.f32 %v1668_v22, %v3550_v21 }
 0x7ec   : > { %v1669_v27 = vadd.f32 %v1667_v25, %v3555_v24 }
 0x7ed   : > { %v1674_v28 = vsel %vm1062_vm8, %v1670_v26, -inf }
 0x7ee   : > { %1675 = vmax.xlane.f32.xlu0 %v1674_v28  ;;  %v1671_v29 = vsel %vm1062_vm8, %v1669_v27, -inf }
 0x7ef   : > { %1672 = vmax.xlane.f32.xlu1 %v1671_v29 }
 0x87b   : > { %v1676_v5 = vpop.xlane.xlu0 %1675 }
 0x87c   : > { %v1678_v30 = vsub.f32 %v1670_v26, %v1676_v5  ;;  %v1673_v31 = vpop.xlane.xlu1 %1672  ;;  %v1955_v5 = vld [vmem:[%s3438_s2] sm:$0xff] }
 0x87d   : > { %v1677_v32 = vsub.f32 %v1669_v27, %v1673_v31  ;;  %v1957_v31 = vld [vmem:[%s3438_s2 + $0x10] sm:$0xff] }
 0x87e   : > { %v1681_v33 = vmul.f32 1.442695, %v1678_v30  ;;  %v1956_v30 = vld [vmem:[%s3438_s2 + $0x8] sm:$0xff] }
 0x87f   : > { %v1679_v34 = vmul.f32 1.442695, %v1677_v32  ;;  %v3038_v32 = vpack.c.bf16 %v1956_v30, %v1955_v5 }
 0x880   : > { %3182 = vpow2.f32 %v1681_v33  ;;  %v1958_v33 = vld [vmem:[%s3438_s2 + $0x18] sm:$0xff] }
 0x881   : > { %3184 = vpow2.f32 %v1679_v34  ;;  %v3042_v34 = vpack.c.bf16 %v1958_v33, %v1957_v31  ;;  %3039 = vmatprep.subr.bf16.mxu1 %v3038_v32  ;;  %v2064_v31 = vsub.s32 7, %v3496_v55 }
 0x882   : > { %3041 = vmatpush3.bf16.msra.mxu1 %v3038_v32 }
 0x883   : > { %3043 = vmatprep.subr.bf16.mxu1 %v3042_v34  ;;  %v2065_v32 = vrot.slane %v3500_v57, %v2064_v31  ;;  %v2384_v31 = vld [vmem:[%s3824_s13 + $0x8] sm:$0xff] (!%p2697_p5) }
 0x886   : > { %3045 = vmatpush3.bf16.msra.mxu1 %v3042_v34 }
 0x88a   : > { %v3183_v35 = vpop.eup %3182 }
 0x88b   : > { %v3185_v40 = vpop.eup %3184  ;;  %v1686_v21 = vsel %vm1062_vm8, %v3183_v35, 0.0 }
 0x88c   : > { %1687 = vadd.xlane.f32.xlu1 %v1686_v21  ;;  %v1683_v24 = vsel %vm1062_vm8, %v3185_v40, 0.0 }
 0x88d   : > { %1684 = vadd.xlane.f32.xlu0 %v1683_v24 }
 0x89d   : > { %1782 = vrot.lane.b32.xlu1 %v3597_v39, %s3313_s17 }
 0x8a1   : > { %1784 = vrot.lane.b32.xlu1 %v3595_v38, %s3313_s17 }
 0x8a3   : > { %3154 = vrot.lane.b32.xlu0 %v3569_v59, %s3312_s23 }
 0x8a5   : > { %1792 = vrot.lane.b32.xlu1 %v2877_v18, %s3314_s18 }
 0x8a7   : > { %1790 = vrot.lane.b32.xlu0 %v1567_v19, %s3314_s18 }
 0x919   : > { %v1688_v41 = vpop.xlane.xlu1 %1687 }
 0x91a   : > { %3186 = vrcp.f32 %v1688_v41  ;;  %v1685_v42 = vpop.xlane.xlu0 %1684 }
 0x91b   : > { %3188 = vrcp.f32 %v1685_v42 }
 0x91d   : > { %v1783_v1 = vpop.permute.xlu1 %1782 }
 0x91e   : > { %v3155_v43 = vpop.permute.xlu0 %3154  ;;  %v1804_v7 = vsel %vm970_vm6, %v3593_v37, %v1783_v1 }
 0x91f   : > { %v3157_v44 = vunpack.i.h.bf16 %v3155_v43  ;;  %v3156_v39 = vunpack.i.l.bf16 %v3155_v43 }
 0x921   : > { %v3026_v46 = vpack.c.bf16 %v3157_v44, %v3156_v39  ;;  %v1785_v2 = vpop.permute.xlu1 %1784 }
 0x922   : > { %v1791_v4 = vpop.permute.xlu0 %1790  ;;  %v1805_v9 = vsel %vm970_vm6, %v3591_v36, %v1785_v2  ;;  %vm2467_vm6 = vcmask (!%p2697_p5), 17408  }
 0x923   : > { %3027 = vmatprep.subr.bf16.mxu0 %v3026_v46  ;;  %v1806_v10 = vsel %vm1062_vm8, %v1804_v7, %v1791_v4 }
 0x924   : > { %v3187_v38 = vpop.eup %3186  ;;  %3029 = vmatpush3.bf16.msra.mxu0 %v3026_v46 }
 0x925   : > { %v3189_v47 = vpop.eup %3188  ;;  %v1692_v48 = vmul.f32 %v3187_v38, %v3183_v35  ;;  %3031 = vmatprep.subr.bf16.mxu0 %v3030_v53  ;;  %v1793_v3 = vpop.permute.xlu1 %1792 }
 0x926   : > { %v1690_v59 = vmul.f32 %v3189_v47, %v3185_v40  ;;  %v1807_v12 = vsel %vm1062_vm8, %v1805_v9, %v1793_v3  ;;  %v2054_v9 = vld [vmem:[%s3448_s16] sm:$0xff] }
 0x928   : > { %2889 = vmatprep.mubr.msk.f32.mxu0 %vm1062_vm8, %v1690_v59 }
 0x929   : > { %2890 = vmatmul.mubr.msk.f32.vlgmr.msra.gmra.mrb[8].mxu0 %vm1062_vm8, %v1692_v48 }
 0x92a   : > { %3033 = vmatpush3.bf16.msra.mxu0 %v3030_v53  ;;  %v1951_v53 = vsub.s32 5, %v3496_v55 }
 0x92b   : > { %3035 = vmatprep.subr.bf16.mxu0 %v3034_v58 }
 0x92e   : > { %3037 = vmatpush3.bf16.msra.mxu0 %v3034_v58 }
 0x9fc   : > { %v2891_v61 = vpop.f32.mrb[8].mxu0 }
 0x9fd   : > { %1800 = vrot.lane.b32.xlu1 %v2891_v61, %s3315_s27  ;;  %v1771_v0 = vpop.f32.mrb[9].mxu0 }
 0x9fe   : > { %1798 = vrot.lane.b32.xlu0 %v1771_v0, %s3315_s27  ;;  %v1952_v0 = vrot.slane %v3500_v57, %v1951_v53 }
 0xa6f   : > { %v1801_v8 = vpop.permute.xlu1 %1800 }
 0xa70   : > { %v1799_v11 = vpop.permute.xlu0 %1798  ;;  %v1810_v13 = vsel %vm1808_vm9, %v1807_v12, %v1801_v8  ;;  %v2056_v12 = vld [vmem:[%s3448_s16 + $0x10] sm:$0xff] }
 0xa71   : > { %v1809_v6 = vsel %vm1808_vm9, %v1806_v10, %v1799_v11  ;;  %v2055_v10 = vld [vmem:[%s3448_s16 + $0x8] sm:$0xff] }
 0xa72   : > { %2900 = vmatprep.mubr.msk.f32.mxu0 %vm718_vm5, %v1809_v6  ;;  %v3046_v11 = vpack.c.bf16 %v2055_v10, %v2054_v9  ;;  %v2057_v6 = vld [vmem:[%s3448_s16 + $0x18] sm:$0xff] }
 0xa73   : > { %2901 = vmatmul.mubr.msk.f32.vlgmr.msra.gmra.mrb[10].mxu0 %vm718_vm5, %v1810_v13  ;;  %v3050_v13 = vpack.c.bf16 %v2057_v6, %v2056_v12  ;;  %v709_v12 = vld [vmem:[%s3453_s5 + $0x8] sm:$0xff] }
 0xa74   : > { %3047 = vmatprep.subr.bf16.mxu0 %v3046_v11  ;;  %v2193_v6 = vrot.slane %v709_v12, %v716_v56  ;;  %v2213_v56 = vld [vmem:[%s3820_s9] sm:$0xff] (!%p2697_p5) }
 0xa75   : > { %3049 = vmatpush3.bf16.msra.mxu0 %v3046_v11 }
 0xa76   : > { %3051 = vmatprep.subr.bf16.mxu0 %v3050_v13 }
 0xa79   : > { %3053 = vmatpush3.bf16.msra.mxu0 %v3050_v13 }
 0xb46   : > { %v2902_v37 = vpop.f32.mrb[10].mxu0 }
 0xb47   : > { %v1897_v60 = vadd.f32 %v2902_v37, %v1818_v14  ;;  %v1891_v15 = vpop.f32.mrb[11].mxu0 }
 0xb48   : > { %v1892_v16 = vadd.f32 %v1891_v15, %v1818_v14  ;;  %v2059_v14 = vld [vmem:[%s3448_s16 + $0x28] sm:$0xff]  ;;  %v2061_v15 = vld [vmem:[%s3448_s16 + $0x38] sm:$0xff] }
 0xb49   : > { %v1901_v36 = vadd.f32 %v1897_v60, %v3488_v52  ;;  %v3054_v37 = vpack.c.bf16 %v2059_v14, %v2058_v63  ;;  %v2060_v60 = vld [vmem:[%s3448_s16 + $0x30] sm:$0xff]  ;;  %v2199_v14 = vrot.slane %v709_v12, %v807_v62 }
 0xb4a   : > { %v1900_v17 = vadd.f32 %v1892_v16, %v3478_v45  ;;  %v3058_v16 = vpack.c.bf16 %v2061_v15, %v2060_v60  ;;  %v2215_v62 = vld [vmem:[%s3820_s9 + $0x10] sm:$0xff] (!%p2697_p5) }
 0xb4b   : > { %v1905_v18 = vsel %vm718_vm5, %v1901_v36, 0.0  ;;  %3055 = vmatprep.subr.bf16.mxu0 %v3054_v37 }
 0xb4c   : > { %1906 = vadd.xlane.f32.xlu1 %v1905_v18  ;;  %v1902_v19 = vsel %vm718_vm5, %v1900_v17, 0.0  ;;  %3057 = vmatpush3.bf16.msra.mxu0 %v3054_v37 }
 0xb4d   : > { %1903 = vadd.xlane.f32.xlu0 %v1902_v19  ;;  %3059 = vmatprep.subr.bf16.mxu0 %v3058_v16 }
 0xb50   : > { %3061 = vmatpush3.bf16.msra.mxu0 %v3058_v16 }
 0xbd9   : > { %v1907_v20 = vpop.xlane.xlu1 %1906 }
 0xbda   : > { %v1910_v22 = vmul.f32 0.03125, %v1907_v20  ;;  %v1904_v23 = vpop.xlane.xlu0 %1903 }
 0xbdb   : > { %v1909_v25 = vmul.f32 0.03125, %v1904_v23 }
 0xbdc   : > { %v1912_v26 = vsub.f32 %v1901_v36, %v1910_v22  ;;  %v1961_v36 = vsub.s32 6, %v3496_v55  ;;  %v2214_v55 = vld [vmem:[%s3820_s9 + $0x8] sm:$0xff] (!%p2697_p5) }
 0xbdd   : > { %v1911_v27 = vsub.f32 %v1900_v17, %v1909_v25 }
 0xbde   : > { %v1914_v45 = vmul.f32 %v1912_v26, %v1912_v26  ;;  %v1962_v17 = vrot.slane %v3500_v57, %v1961_v36 }
 0xbdf   : > { %v1913_v28 = vmul.f32 %v1911_v27, %v1911_v27 }
 0xbe0   : > { %v1918_v29 = vsel %vm718_vm5, %v1914_v45, 0.0 }
 0xbe1   : > { %v1915_v52 = vsel %vm718_vm5, %v1913_v28, 0.0 }
 0xbe2   : > { %1916 = vadd.xlane.f32.xlu0 %v1915_v52 }
 0xbe6   : > { %1919 = vadd.xlane.f32.xlu0 %v1918_v29 }
 0xc6f   : > { %v1917_v35 = vpop.xlane.xlu0 %1916 }
 0xc70   : > { %v1921_v40 = vmul.f32 0.032258064, %v1917_v35 }
 0xc72   : > { %3190 = vrsqrt.f32 %v1921_v40  ;;  %vm1925_vm10 = vcmp.eq.f32.partialorder %v1921_v40, inf  ;;  %v1928_v43 = vand.u32 2147483648, %v1921_v40  ;;  %vm1927_vm11 = vcmp.eq.f32.partialorder %v1921_v40, 0.0 }
 0xc73   : > { %v1920_v21 = vpop.xlane.xlu0 %1919 }
 0xc74   : > { %v1922_v24 = vmul.f32 0.032258064, %v1920_v21 }
 0xc76   : > { %3192 = vrsqrt.f32 %v1922_v24  ;;  %vm1932_vm12 = vcmp.eq.f32.partialorder %v1922_v24, inf  ;;  %v1935_v59 = vand.u32 2147483648, %v1922_v24  ;;  %vm1934_vm13 = vcmp.eq.f32.partialorder %v1922_v24, 0.0 }
 0xc7c   : > { %v3191_v41 = vpop.eup %3190 }
 0xc7d   : > { %v1924_v42 = vmul.f32 %v3191_v41, %v1921_v40 }
 0xc7f   : > { %v1926_v44 = vsel %vm1925_vm10, %v1921_v40, %v1924_v42 }
 0xc80   : > { %v3193_v39 = vpop.eup %3192  ;;  %v1929_v46 = vsel %vm1927_vm11, %v1928_v43, %v1926_v44 }
 0xc81   : > { %v1937_v38 = vadd.f32 1e-06, %v1929_v46  ;;  %v1931_v47 = vmul.f32 %v3193_v39, %v1922_v24 }
 0xc83   : > { %3194 = vrcp.f32 %v1937_v38  ;;  %v1933_v48 = vsel %vm1932_vm12, %v1922_v24, %v1931_v47 }
 0xc84   : > { %v1936_v49 = vsel %vm1934_vm13, %v1935_v59, %v1933_v48 }
 0xc85   : > { %v1938_v50 = vadd.f32 1e-06, %v1936_v49 }
 0xc87   : > { %3196 = vrcp.f32 %v1938_v50 }
 0xc8d   : > { %v3195_v58 = vpop.eup %3194 }
 0xc8e   : > { %v1940_v61 = vmul.f32 %v3195_v58, %v1911_v27 }
 0xc90   : > { %v1947_v1 = vmul.f32 %v1946_v54, %v1940_v61 }
 0xc91   : > { %v3197_v2 = vpop.eup %3196 }
 0xc92   : > { %v1942_v3 = vmul.f32 %v3197_v2, %v1912_v26  ;;  %v1953_v4 = vadd.f32 %v1952_v0, %v1947_v1 }
 0xc94   : > { %v1948_v7 = vmul.f32 %v1946_v54, %v1942_v3  ;;  %2911 = vmatprep.mubr.msk.f32.mxu1 %vm718_vm5, %v1953_v4 }
 0xc96   : > { %v1954_v8 = vadd.f32 %v1952_v0, %v1948_v7 }
 0xc98   : > { %2912 = vmatmul.mubr.msk.f32.vlgmr.msra.gmra.mrb[12].mxu1 %vm718_vm5, %v1954_v8 }
 0xd6b   : > { %v2913_v18 = vpop.f32.mrb[12].mxu1 }
 0xd6c   : > { %v2041_v19 = vadd.f32 %v2913_v18, %v1962_v17  ;;  %v2035_v20 = vpop.f32.mrb[13].mxu1  ;;  %v3316_v18 = vmov (!%p2697_p5), 0.0|0.0  }
 0xd6d   : > { %v2036_v22 = vadd.f32 %v2035_v20, %v1962_v17  ;;  %3062 = vmatprep.subr.bf16.mxu0 (!%p2697_p5), %v3316_v18  ;;  %v2216_v20 = vld [vmem:[%s3820_s9 + $0x18] sm:$0xff] (!%p2697_p5)  ;;  %3068 = vmatprep.subr.bf16.mxu1 (!%p2697_p5), %v3316_v18 }
 0xd6e   : > { %v2047_v23 = vmul.f32 0.70710677, %v2041_v19  ;;  %v2045_v29 = vmul.f32 0.5, %v2041_v19  ;;  %v3063_v19 = vpack.c.bf16 (!%p2697_p5), %v2214_v55, %v2213_v56 }
 0xd6f   : > { %v2046_v25 = vmul.f32 0.70710677, %v2036_v22  ;;  %v2044_v52 = vmul.f32 0.5, %v2036_v22  ;;  %v3318_v22 = vmov (!%p2697_p5), 0.0  }
 0xd70   : > { %3198 = verf.f32 %v2047_v23  ;;  %2952 = vmatprep.mubr.msk.f32.mxu1 (!%p2697_p5), %vm3317_vm3, %v3318_v22  ;;  %v3066_v23 = vpack.c.bf16 (!%p2697_p5), %v2216_v20, %v2215_v62 }
 0xd71   : > { %3200 = verf.f32 %v2046_v25 }
 0xd7a   : > { %v3199_v26 = vpop.eup %3198 }
 0xd7b   : > { %v3201_v27 = vpop.eup %3200  ;;  %v2051_v28 = vadd.f32 1.0, %v3199_v26 }
 0xd7c   : > { %v2050_v45 = vadd.f32 1.0, %v3201_v27  ;;  %v2298_v27 = vld [vmem:[%s3822_s11] sm:$0xff] (!%p2697_p5) }
 0xd7d   : > { %v2053_v30 = vmul.f32 %v2051_v28, %v2045_v29  ;;  %v2299_v28 = vld [vmem:[%s3822_s11 + $0x8] sm:$0xff] (!%p2697_p5)  ;;  %v2301_v29 = vld [vmem:[%s3822_s11 + $0x18] sm:$0xff] (!%p2697_p5) }
 0xd7e   : > { %v2052_v5 = vmul.f32 %v2050_v45, %v2044_v52  ;;  %v2300_v52 = vld [vmem:[%s3822_s11 + $0x10] sm:$0xff] (!%p2697_p5)  ;;  %v3069_v45 = vpack.c.bf16 (!%p2697_p5), %v2299_v28, %v2298_v27 }
 0xd80   : > { %2930 = vmatprep.mubr.msk.f32.mxu0 %vm2066_vm14, %v2052_v5  ;;  %3070 = vmatpush3.bf16.msra.mxu1 (!%p2697_p5), %v3069_v45  ;;  %v3072_v5 = vpack.c.bf16 (!%p2697_p5), %v2301_v29, %v2300_v52 }
 0xd81   : > { %2931 = vmatmul.mubr.msk.f32.vlgmr.msra.gmra.mrb[12].mxu0 %vm2066_vm14, %v2053_v30  ;;  %3071 = vmatprep.subr.bf16.mxu1 (!%p2697_p5), %v3316_v18  ;;  %v2383_v30 = vld [vmem:[%s3824_s13] sm:$0xff] (!%p2697_p5) }
 0xd82   : > { %2941 = vmatprep.mubr.msk.f32.mxu0 (!%p2697_p5), %vm3317_vm3, %v3318_v22  ;;  %3064 = vmatpush3.bf16.msra.mxu0 (!%p2697_p5), %v3063_v19 }
 0xd83   : > { %3065 = vmatprep.subr.bf16.mxu0 (!%p2697_p5), %v3316_v18 }
 0xd84   : > { %3073 = vmatpush3.bf16.msra.mxu1 (!%p2697_p5), %v3072_v5 }
 0xd86   : > { %3067 = vmatpush3.bf16.msra.mxu0 (!%p2697_p5), %v3066_v23 }
 0xd87   : > { %3074 = vmatprep.subr.bf16.mxu0 (!%p2697_p5), %v3316_v18 }
 0xe54   : > { %v2932_v33 = vpop.f32.mrb[12].mxu0 }
 0xe55   : > { %v2145_v34 = vadd.f32 %v2932_v33, %v2065_v32  ;;  %v2139_v35 = vpop.f32.mrb[13].mxu0  ;;  %v2698_v33 = vld [vmem:[%s3821_s10] ss:$0 sm:$0xff] (!%p2697_p5) }
 0xe56   : > { %v2140_v40 = vadd.f32 %v2139_v35, %v2065_v32  ;;  %v3075_v32 = vpack.c.bf16 (!%p2697_p5), %v2384_v31, %v2383_v30 }
 0xe57   : > { %v2149_v21 = vadd.f32 %v2145_v34, %v1954_v8 }
 0xe58   : > { %v2148_v24 = vadd.f32 %v2140_v40, %v1953_v4 }
 0xe59   : > { %v2153_v41 = vsel %vm718_vm5, %v2149_v21, 0.0 }
 0xe5a   : > { %2154 = vadd.xlane.f32.xlu0 %v2153_v41  ;;  %v2150_v42 = vsel %vm718_vm5, %v2148_v24, 0.0  ;;  %v2386_v41 = vld [vmem:[%s3824_s13 + $0x18] sm:$0xff] (!%p2697_p5) }
 0xe5b   : > { %2151 = vadd.xlane.f32.xlu1 %v2150_v42 }
 0xee7   : > { %v2155_v43 = vpop.xlane.xlu0 %2154 }
 0xee8   : > { %v2157_v44 = vmul.f32 0.03125, %v2155_v43  ;;  %v2152_v39 = vpop.xlane.xlu1 %2151  ;;  %v2700_v43 = vld [vmem:[%s3823_s12] ss:$0 sm:$0xff] (!%p2697_p5) }
 0xee9   : > { %v2156_v46 = vmul.f32 0.03125, %v2152_v39 }
 0xeea   : > { %v2159_v38 = vsub.f32 %v2149_v21, %v2157_v44 }
 0xeeb   : > { %v2158_v47 = vsub.f32 %v2148_v24, %v2156_v46  ;;  %v2385_v24 = vld [vmem:[%s3824_s13 + $0x10] sm:$0xff] (!%p2697_p5) }
 0xeec   : > { %v2161_v59 = vmul.f32 %v2159_v38, %v2159_v38  ;;  %v3078_v42 = vpack.c.bf16 (!%p2697_p5), %v2386_v41, %v2385_v24 }
 0xeed   : > { %v2160_v57 = vmul.f32 %v2158_v47, %v2158_v47 }
 0xeee   : > { %v2165_v48 = vsel %vm718_vm5, %v2161_v59, 0.0 }
 0xeef   : > { %2166 = vadd.xlane.f32.xlu0 %v2165_v48  ;;  %v2162_v49 = vsel %vm718_vm5, %v2160_v57, 0.0 }
 0xef0   : > { %2163 = vadd.xlane.f32.xlu1 %v2162_v49 }
 0xf7c   : > { %v2167_v50 = vpop.xlane.xlu0 %2166 }
 0xf7d   : > { %v2169_v51 = vmul.f32 0.032258064, %v2167_v50  ;;  %v2164_v53 = vpop.xlane.xlu1 %2163 }
 0xf7e   : > { %v2168_v54 = vmul.f32 0.032258064, %v2164_v53 }
 0xf7f   : > { %3202 = vrsqrt.f32 %v2169_v51  ;;  %vm2179_vm15 = vcmp.eq.f32.partialorder %v2169_v51, inf  ;;  %v2182_v1 = vand.u32 2147483648, %v2169_v51  ;;  %vm2181_vm0 = vcmp.eq.f32.partialorder %v2169_v51, 0.0 }
 0xf80   : > { %3204 = vrsqrt.f32 %v2168_v54  ;;  %vm2172_vm1 = vcmp.eq.f32.partialorder %v2168_v54, inf  ;;  %v2175_v4 = vand.u32 2147483648, %v2168_v54  ;;  %vm2174_vm2 = vcmp.eq.f32.partialorder %v2168_v54, 0.0 }
 0xf89   : > { %v3203_v58 = vpop.eup %3202 }
 0xf8a   : > { %v3205_v61 = vpop.eup %3204  ;;  %v2178_v0 = vmul.f32 %v3203_v58, %v2169_v51 }
 0xf8b   : > { %v2171_v2 = vmul.f32 %v3205_v61, %v2168_v54 }
 0xf8c   : > { %v2180_v3 = vsel %vm2179_vm15, %v2169_v51, %v2178_v0 }
 0xf8d   : > { %v2183_v7 = vsel %vm2181_vm0, %v2182_v1, %v2180_v3  ;;  %v2173_v8 = vsel %vm2172_vm1, %v2168_v54, %v2171_v2  ;;  %v2481_v2 = vld [vmem:[%s3826_s15] sm:$0x3] (!%p2697_p5) }
 0xf8e   : > { %v2185_v9 = vadd.f32 1e-06, %v2183_v7  ;;  %v2176_v10 = vsel %vm2174_vm2, %v2175_v4, %v2173_v8 }
 0xf8f   : > { %v2184_v11 = vadd.f32 1e-06, %v2176_v10 }
 0xf90   : > { %3206 = vrcp.f32 %v2185_v9 }
 0xf91   : > { %3208 = vrcp.f32 %v2184_v11 }
 0xf9a   : > { %v3207_v13 = vpop.eup %3206 }
 0xf9b   : > { %v3209_v63 = vpop.eup %3208  ;;  %v2189_v37 = vmul.f32 %v3207_v13, %v2159_v38 }
 0xf9c   : > { %v2187_v60 = vmul.f32 %v3209_v63, %v2158_v47  ;;  %2207 = sbr.rel (%p2697_p5) target bundleno = 5138 (0x1412), region = 92  ;;  %v2702_v47 = vld [vmem:[%s3825_s14] ss:$0 sm:$0xff] (!%p2697_p5) }
 0xf9d   : > { %v2195_v15 = vmul.f32 %v2193_v6, %v2189_v37 }
 0xf9e   : > { %v2194_v16 = vmul.f32 %v2193_v6, %v2187_v60 }
 0xf9f   : > { %v2201_v36 = vadd.f32 %v2199_v14, %v2195_v15 }
 0xfa0   : > { %v2200_v17 = vadd.f32 %v2199_v14, %v2194_v16 }
 0xfa1   : > { %2203 = vst.msk [vmem:[#allocation2 + $0x8] sm:$0xff] %vm718_vm5, %v2201_v36  ;;  %v2209_v25 = vrot.slane (!%p2697_p5), %v2201_v36, 7 }
 0xfa2   : > { %2202 = vst.msk [vmem:[#allocation2] sm:$0xff] %vm718_vm5, %v2200_v17 }
 0xfa3   : > { %v2212_v26 = vsel %vm2211_vm4, %v2200_v17, %v2209_v25 }
 0xfa4   : > { %2942 = vmatmul.mubr.msk.f32.vlgmr.msra.gmra.mrb[0].mxu0 %vm718_vm5, %v2212_v26 }
 0xfa5   : > { %2963 = vmatprep.mubr.msk.f32.mxu0 %vm3317_vm3, %v3318_v22  ;;  %3076 = vmatpush3.bf16.msra.mxu0 %v3075_v32 }
 0xfa6   : > { %3077 = vmatprep.subr.bf16.mxu0 %v3316_v18 }
 0xfa9   : > { %3079 = vmatpush3.bf16.msra.mxu0 %v3078_v42 }
0x1077   : > { %v2293_v34 = vpop.f32.mrb[0].mxu0 }
0x1078   : > { %v2294_v35 = vadd.f32 %v2698_v33, %v2293_v34  ;;  %v2943_v40 = vpop.f32.mrb[1].mxu0 }
0x107a   : > { %3210 = vtanh.f32 %v2294_v35 }
0x1084   : > { %v3211_v21 = vpop.eup %3210 }
0x1085   : > { %2953 = vmatmul.mubr.msk.f32.vlgmr.msra.gmra.mrb[0].mxu1 %vm718_vm5, %v3211_v21 }
0x1158   : > { %v2378_v44 = vpop.f32.mrb[0].mxu1 }
0x1159   : > { %v2379_v39 = vadd.f32 %v2700_v43, %v2378_v44  ;;  %v2954_v46 = vpop.f32.mrb[1].mxu1 }
0x115b   : > { %v2382_v38 = vmax.f32 %v2379_v39, 0.0 }
0x115d   : > { %2964 = vmatmul.mubr.msk.f32.vlgmr.msra.gmra.mrb[2].mxu0 %vm718_vm5, %v2382_v38  ;;  %vm2487_vm5 = vcmask 1041408  }
0x1230   : > { %v2463_v59 = vpop.f32.mrb[2].mxu0 }
0x1231   : > { %v2464_v57 = vadd.f32 %v2702_v47, %v2463_v59  ;;  %v2965_v48 = vpop.f32.mrb[3].mxu0 }
0x1233   : > { %v2469_v49 = vsel %vm2467_vm6, %v2464_v57, -inf  ;;  %2468 = vst.msk [vmem:[#allocation4] sm:$0x3] %vm2467_vm6, %v2464_v57 }
0x1234   : > { %2470 = vmax.xlane.f32.xlu0 %v2469_v49 }
0x12c1   : > { %v2471_v50 = vpop.xlane.xlu0 %2470 }
0x12c2   : > { %v2472_v51 = vsub.f32 %v2464_v57, %v2471_v50 }
0x12c4   : > { %v2473_v53 = vmul.f32 1.442695, %v2472_v51 }
0x12c6   : > { %3212 = vpow2.f32 %v2473_v53 }
0x12d0   : > { %v3213_v54 = vpop.eup %3212 }
0x12d1   : > { %v2475_v58 = vsel %vm2467_vm6, %v3213_v54, 0.0 }
0x12d2   : > { %2476 = vadd.xlane.f32.xlu0 %v2475_v58 }
0x135f   : > { %v2477_v61 = vpop.xlane.xlu0 %2476 }
0x1360   : > { %3214 = vlog2.f32 %v2477_v61 }
0x136a   : > { %v3215_v0 = vpop.eup %3214 }
0x136b   : > { %v2479_v1 = vmul.f32 0.6931472, %v3215_v0 }
0x136d   : > { %v2480_v3 = vsub.f32 %v2472_v51, %v2479_v1 }
0x136f   : > { %v2482_v4 = vmul.f32 %v2481_v2, %v2480_v3 }
0x1371   : > { %v2483_v7 = vsel %vm2467_vm6, %v2482_v4, 0.0 }
0x1372   : > { %2484 = vadd.xlane.f32.xlu1 %v2483_v7 }
0x13ff   : > { %v2485_v8 = vpop.xlane.xlu1 %2484 }
0x1400   : > { %v2486_v9 = vsub.f32 0.0, %v2485_v8 }
0x1402   : > { %v2488_v10 = vsel %vm2487_vm5, %v2486_v9, 0.0 }
0x1403   : > { %v2489_v11 = vrot.slane %v2488_v10, 4 }
0x1405   : > { %v2490_v12 = vadd.f32 %v2489_v11, %v2488_v10 }
0x1407   : > { %v2491_v6 = vrot.slane %v2490_v12, 2 }
0x1409   : > { %v2492_v13 = vadd.f32 %v2491_v6, %v2490_v12 }
0x140b   : > { %v2493_v63 = vrot.slane %v2492_v13, 1 }
0x140d   : > { %v2494_v14 = vadd.f32 %v2493_v63, %v2492_v13 }
0x140f   : > { %v2495_v37 = vmul.f32 0.5, %v2494_v14 }
0x1411   : > { %2497 = vst.msk [vmem:[#allocation6] sm:$0x1] %vm2496_vm7, %v2495_v37 }
0x1412 PF: > { %p3093_p6 = scmp.eq.s32.totalorder %s3424_s28, 1  ;;  %s3319_s20 = smov [#allocation4]  }
0x1413   : > { %s2518_s2 = sshll.u32 %s3319_s20, 4  ;;  %s3320_s29 = smov [#allocation2]   ;;  %s2519_s2 = int_to_ptr.vmem [resolvable:$true] %s2518_s2 }
0x1414   : > { %s2504_s24 = sshll.u32 %s3320_s29, 4  ;;  %s3216_s26 = scalar_lea.vmem %s2519_s2, 32  ;;  %s2505_s24 = int_to_ptr.vmem [resolvable:$true] %s2504_s24 }
0x1415   : > { %p3217_p7 = scmp.ne.s32.totalorder %s2519_s2, %s3216_s26  ;;  %p3223_p10 = scmp.lt.s32.totalorder %s2519_s2, %s2519_s2 }
0x1416   : > { %p3224_p11 = scmp.lt.s32.totalorder %s3216_s26, %s3216_s26 }
0x1417   : > { %p3218_p8 = pnand %p3217_p7, %p3093_p6 }
0x1418   : > { %p3225_p12 = por %p3224_p11, %p3223_p10 }
0x1419   : > { %p3219_p9 = pneg %p3218_p8 }
0x141b   : > { %p3226_p13 = pnand %p3225_p12, %p3219_p9 }
0x141d   : > { %3229 = shalt.err (!%p3226_p13)
}
0x141e   : > { %s3850_s0 = sld [smem:[#allocation15_spill]] }
0x1424   : > { %s3230_s21 = scalar_lea.hbm %s3850_s0, 32 }
0x1425   : > { %p3231_p0 = scmp.ne.s32.totalorder %s3850_s0, %s3230_s21  ;;  %p3236_p3 = scmp.lt.u32.totalorder %s3230_s21, %s3850_s0 }
0x1427   : > { %p3232_p1 = pnand %p3231_p0, %p3093_p6 }
0x1429   : > { %p3233_p2 = pneg %p3232_p1 }
0x142b   : > { %p3238_p4 = pnand %p3236_p3, %p3233_p2 }
0x142d   : > { %3241 = shalt.err (!%p3238_p4)
}
0x142e   : > { %3084 = dma.vmem_to_hbm [thread:$0]  (%p3093_p6), %s2519_s2, 32, %s3850_s0, [#allocation5]  }
0x142f   : > { %s3242_s20 = scalar_lea.vmem %s2505_s24, 256  ;;  %p3249_p9 = scmp.lt.s32.totalorder %s2505_s24, %s2505_s24 }
0x1430   : > { %p3243_p5 = scmp.ne.s32.totalorder %s2505_s24, %s3242_s20  ;;  %p3250_p10 = scmp.lt.s32.totalorder %s3242_s20, %s3242_s20 }
0x1432   : > { %p3244_p7 = pnand %p3243_p5, %p3093_p6  ;;  %p3251_p11 = por %p3250_p10, %p3249_p9 }
0x1434   : > { %p3245_p8 = pneg %p3244_p7 }
0x1436   : > { %p3252_p12 = pnand %p3251_p11, %p3245_p8 }
0x1438   : > { %3255 = shalt.err (!%p3252_p12)
}
0x1439   : > { %s3851_s25 = sld [smem:[#allocation14_spill]] }
0x143f   : > { %s3256_s19 = scalar_lea.hbm %s3851_s25, 256 }
0x1440   : > { %p3257_p13 = scmp.ne.s32.totalorder %s3851_s25, %s3256_s19  ;;  %p3262_p2 = scmp.lt.u32.totalorder %s3256_s19, %s3851_s25 }
0x1442   : > { %p3258_p0 = pnand %p3257_p13, %p3093_p6 }
0x1444   : > { %p3259_p1 = pneg %p3258_p0 }
0x1446   : > { %p3264_p3 = pnand %p3262_p2, %p3259_p1 }
0x1448   : > { %3267 = shalt.err (!%p3264_p3)
}
0x1449   : > { %s3321_s18 = smov 128   ;;  %s3322_s16 = smov [#allocation6]  }
0x144a   : > { %3082 = dma.vmem_to_hbm [thread:$0]  (%p3093_p6), %s2505_s24, 256, %s3851_s25, [#allocation3], %s3321_s18, %s3321_s18, %s3313_s17  }
0x144b   : > { %s2529_s20 = sshll.u32 %s3322_s16, 4  ;;  %s2530_s20 = int_to_ptr.vmem [resolvable:$true] %s2529_s20 }
0x144c   : > { %s3268_s29 = scalar_lea.vmem %s2530_s20, 16  ;;  %s3274_s26 = scalar_lea.vmem %s2530_s20, 32 }
0x144d   : > { %p3269_p4 = scmp.ne.s32.totalorder %s2530_s20, %s3268_s29  ;;  %p3275_p8 = scmp.lt.s32.totalorder %s2530_s20, %s2530_s20 }
0x144e   : > { %p3276_p9 = scmp.lt.s32.totalorder %s3274_s26, %s3268_s29 }
0x144f   : > { %p3270_p5 = pnand %p3269_p4, %p3093_p6 }
0x1450   : > { %p3277_p10 = por %p3276_p9, %p3275_p8 }
0x1451   : > { %p3271_p7 = pneg %p3270_p5 }
0x1453   : > { %p3278_p11 = pnand %p3277_p10, %p3271_p7 }
0x1455   : > { %3281 = shalt.err (!%p3278_p11)
}
0x1456   : > { %s3852_s30 = sld [smem:[#allocation16_spill]] }
0x145c   : > { %s3282_s2 = scalar_lea.hbm %s3852_s30, 16 }
0x145d   : > { %p3283_p12 = scmp.ne.s32.totalorder %s3852_s30, %s3282_s2  ;;  %p3288_p1 = scmp.lt.u32.totalorder %s3282_s2, %s3852_s30 }
0x145f   : > { %p3284_p13 = pnand %p3283_p12, %p3093_p6 }
0x1461   : > { %p3285_p0 = pneg %p3284_p13 }
0x1463   : > { %p3290_p2 = pnand %p3288_p1, %p3285_p0 }
0x1465   : > { %3293 = shalt.err (!%p3290_p2)
}
0x1466   : > { %3086 = dma.vmem_to_hbm [thread:$0]  (%p3093_p6), %s2530_s20, 16, %s3852_s30, [#allocation5]  }
0x1467   : > { %3299 = dma.done.wait (%p3093_p6), [#allocation3], 256  }
0x1468   : > { %3301 = vsyncadd (%p3093_p6), [#allocation3], 4294967040 }
0x1469   : > { %3303 = dma.done.wait (%p3093_p6), [#allocation5], 48  }
0x146a   : > { %3305 = vsyncadd (%p3093_p6), [#allocation5], 4294967248 }
0x146b PF: > { %s3853_s16 = sld [smem:[#allocation9_spill]] }
0x1471   : > { %s31_s27 = sadd.s32 1, %s3853_s16  }
0x1472   : > { %p28_p3 = scmp.ge.s32.totalorder %s31_s27, 4  }
0x1474   :  { %30 = sbr.rel (!%p28_p3) target bundleno = 10 (0xa), region = 149 }
0x147b   :  { %2550 = vsyncpa [#allocation3], 1 }
0x147c   :  { %2552 = vsyncpa [#allocation3 + $0x1], 1 }
0x147d   :  { %2553 = vsyncpa [#allocation5], 1 }

</bundles_post_ra>
